<compile_context>
chip_gen: v7x
topology: tpu7x:2x2x1
jax: 0.10.0
libtpu: 0.0.40
codegen_flags: <defaults>
</compile_context>

<pallas_src>
from typing import NamedTuple

import jax
import jax.numpy as jnp
from jax.experimental import pallas as pl
from jax.experimental.pallas import tpu as pltpu

LN_EPS = 1e-5            # nn.LayerNorm default
_HIDDEN_TILE = 512       # max hidden-dim tile for the gate MLP (multiple of 128)
_ROW_TILE = 256          # default max row tile


def _cdiv(a, b):
    return -(-a // b)


def _round_up(x, m):
    return _cdiv(x, m) * m


class FusionGateParams(NamedTuple):
    """Pre-split / pre-cast / pre-padded weights (built once, reused per call)."""
    w1_g: jax.Array    # [E, H_pad]  gate layer-1 rows that multiply global_repr
    w1_l: jax.Array    # [E, H_pad]  gate layer-1 rows that multiply local_repr
    b1: jax.Array      # [1, H_pad]  f32
    w2: jax.Array      # [H_pad, E]
    b2: jax.Array      # [1, E]      f32
    wg: jax.Array      # [E, E]      transform_global
    bg: jax.Array      # [1, E]      f32
    wl: jax.Array      # [E, E]      transform_local
    bl: jax.Array      # [1, E]      f32
    gamma: jax.Array   # [1, E]      f32
    beta: jax.Array    # [1, E]      f32


def prepare_params(params, *, compute_dtype=None):
    """One-time weight prep, hoisted out of the per-forward path.

    Splits w1 so the kernel never concatenates along lanes, zero-pads the
    hidden dim to a multiple of the hidden tile when it will be grid-tiled,
    and applies the matmul-operand dtype cast once (pass
    compute_dtype=jnp.bfloat16 on v6e/v7x for native-rate MXU matmuls).
    """
    w1, b1, w2, b2, wg, bg, wl, bl, gamma, beta = params
    E = wg.shape[0]
    H = w1.shape[1]
    w_dtype = w1.dtype if compute_dtype is None else compute_dtype

    w1_g, w1_l = w1[:E], w1[E:]
    if H > _HIDDEN_TILE:
        h_pad = _round_up(H, _HIDDEN_TILE) - H
        if h_pad:
            # Zero-padded hidden units contribute relu(0) = 0 through zero rows
            # of w2, so the result is unchanged.
            w1_g = jnp.pad(w1_g, ((0, 0), (0, h_pad)))
            w1_l = jnp.pad(w1_l, ((0, 0), (0, h_pad)))
            b1 = jnp.pad(b1, ((0, 0), (0, h_pad)))
            w2 = jnp.pad(w2, ((0, h_pad), (0, 0)))

    f32 = jnp.float32
    return FusionGateParams(
        w1_g=w1_g.astype(w_dtype), w1_l=w1_l.astype(w_dtype),
        b1=b1.astype(f32),
        w2=w2.astype(w_dtype), b2=b2.astype(f32),
        wg=wg.astype(w_dtype), bg=bg.astype(f32),
        wl=wl.astype(w_dtype), bl=bl.astype(f32),
        gamma=gamma.astype(f32), beta=beta.astype(f32))


def fusion_gate_kernel(
    g_ref, l_ref,                 # [TM, E] row tiles of global / local repr
    w1g_ref, w1l_ref, b1_ref,     # gate layer 1 (H-tiled): [E, TH], [E, TH], [1, TH]
    w2_ref, b2_ref,               # gate layer 2: [TH, E] (H-tiled), [1, E]
    wg_ref, bg_ref,               # transform_global: [E, E], [1, E]
    wl_ref, bl_ref,               # transform_local:  [E, E], [1, E]
    gamma_ref, beta_ref,          # layer_norm affine: [1, E], [1, E]
    fused_ref, gate_ref,          # outputs: [TM, E] each
    z_acc,                        # VMEM scratch [TM, E] f32: gate-logit accumulator
):
    h_step = pl.program_id(1)
    cdt = w1g_ref.dtype
    g = g_ref[...].astype(cdt)
    l = l_ref[...].astype(cdt)

    @pl.when(h_step == 0)
    def _():
        z_acc[...] = jnp.zeros_like(z_acc)

    # ---- gate MLP, partial contribution of this hidden tile ----
    # [g|l] @ w1 == g @ w1[:E] + l @ w1[E:]   (no in-kernel lane concat)
    h = (jnp.dot(g, w1g_ref[...], preferred_element_type=jnp.float32)
         + jnp.dot(l, w1l_ref[...], preferred_element_type=jnp.float32)
         + b1_ref[...])
    h = jnp.maximum(h, 0.0)                                   # ReLU (f32)
    z_acc[...] += jnp.dot(h.astype(cdt), w2_ref[...],
                          preferred_element_type=jnp.float32)

    @pl.when(h_step == pl.num_programs(1) - 1)
    def _():
        gate = jax.nn.sigmoid(z_acc[...] + b2_ref[...])       # [TM, E] f32

        # ---- global / local transforms (f32 accumulation) ----
        gt = jnp.dot(g, wg_ref[...], preferred_element_type=jnp.float32) + bg_ref[...]
        lt = jnp.dot(l, wl_ref[...], preferred_element_type=jnp.float32) + bl_ref[...]

        # ---- gated blend + LayerNorm (biased variance, f32, like torch) ----
        fused = gate * gt + (1.0 - gate) * lt
        mean = jnp.mean(fused, axis=-1, keepdims=True)
        centered = fused - mean
        var = jnp.mean(centered * centered, axis=-1, keepdims=True)
        normed = (centered * jax.lax.rsqrt(var + LN_EPS) * gamma_ref[...]
                  + beta_ref[...])

        # Two direct block stores (no [TM, 2E] concat temp, no wrapper slices).
        fused_ref[...] = normed.astype(fused_ref.dtype)
        gate_ref[...] = gate.astype(gate_ref.dtype)


def _vmem_limit_bytes(tm, E, th, in_bytes, w_bytes, out_bytes):
    used = 0
    used += 2 * 2 * tm * E * in_bytes          # g, l row tiles (double-buffered)
    used += 2 * 2 * E * th * w_bytes           # w1_g, w1_l hidden tiles (double-buffered)
    used += 2 * 1 * th * 4                     # b1 hidden tile
    used += 2 * th * E * w_bytes               # w2 hidden tile (double-buffered)
    used += 2 * E * E * w_bytes                # wg, wl (single-buffered / resident)
    used += 5 * E * 4                          # b2, bg, bl, gamma, beta
    used += 2 * 2 * tm * E * out_bytes         # fused, gate outputs (double-buffered)
    used += tm * E * 4                         # z accumulator scratch
    used += 2 * tm * th * 4 + 6 * tm * E * 4   # f32 intermediates (h, gt, lt, LN temps)
    limit = int(used * 1.25) + (4 << 20)       # headroom for compiler-internal scratch
    try:
        cap = int(pltpu.get_tpu_info().vmem_capacity_bytes) * 7 // 8
    except Exception:                          # pragma: no cover
        cap = 64 << 20                         # conservative (v7x physical VMEM)
    return max(min(limit, cap), 32 << 20)


def fusion_gate(global_repr, local_repr, prep: FusionGateParams, *, tm=_ROW_TILE):
    """Applies FusionGate. Inputs: [B, E] or [B, S, E]. Returns (fused, gate)."""
    orig_shape = global_repr.shape
    E = orig_shape[-1]
    in_dtype = global_repr.dtype
    # TODO(synk): for real models with E < 128 (demo E=32), pad E to 128 host-side
    # once (with a masked LayerNorm) to fill vreg lanes / MXU columns.

    g2d = global_repr.reshape(-1, E)
    l2d = local_repr.reshape(-1, E)
    N = g2d.shape[0]

    H_pad = prep.w1_g.shape[1]
    th = H_pad if H_pad <= _HIDDEN_TILE else _HIDDEN_TILE
    n_h = H_pad // th

    # Row tile: fit the tile to N (avoid padding overshoot) and keep >= 2 row
    # blocks when N allows so v7x's two TensorCores both get work.
    n_rows8 = _round_up(max(N, 1), 8)
    n_blocks = _cdiv(n_rows8, tm)
    if n_blocks < 2 and n_rows8 >= 16:
        n_blocks = 2
    tm_eff = _round_up(_cdiv(n_rows8, n_blocks), 8)
    n_blocks = _cdiv(n_rows8, tm_eff)
    n_pad = n_blocks * tm_eff
    if n_pad != N:
        g2d = jnp.pad(g2d, ((0, n_pad - N), (0, 0)))
        l2d = jnp.pad(l2d, ((0, n_pad - N), (0, 0)))

    row_spec = pl.BlockSpec((tm_eff, E), lambda i, h: (i, 0))
    out_spec = pl.BlockSpec((tm_eff, E), lambda i, h: (i, 0))
    h_col = lambda shape: pl.BlockSpec(shape, lambda i, h: (0, h))   # w1g/w1l/b1
    h_row = pl.BlockSpec((th, E), lambda i, h: (h, 0))               # w2

    vmem_limit = _vmem_limit_bytes(
        tm_eff, E, th,
        jnp.dtype(in_dtype).itemsize,
        jnp.dtype(prep.w1_g.dtype).itemsize,
        jnp.dtype(in_dtype).itemsize)

    def run(single_buffer_weights):
        # Constant-index (DMA'd-once) weights: single buffer halves their VMEM.
        resident_kw = (dict(pipeline_mode=pl.Buffered(1))
                       if single_buffer_weights else {})
        const = lambda shape: pl.BlockSpec(shape, lambda i, h: (0, 0), **resident_kw)
        return pl.pallas_call(
            fusion_gate_kernel,
            out_shape=(jax.ShapeDtypeStruct((n_pad, E), in_dtype),
                       jax.ShapeDtypeStruct((n_pad, E), in_dtype)),
            grid_spec=pltpu.PrefetchScalarGridSpec(
                num_scalar_prefetch=0,
                grid=(n_blocks, n_h),
                in_specs=[
                    row_spec, row_spec,                               # global, local
                    h_col((E, th)), h_col((E, th)), h_col((1, th)),   # gate layer 1
                    h_row, const((1, E)),                             # gate layer 2
                    const((E, E)), const((1, E)),                     # transform_global
                    const((E, E)), const((1, E)),                     # transform_local
                    const((1, E)), const((1, E)),                     # LN gamma / beta
                ],
                out_specs=[out_spec, out_spec],
                scratch_shapes=[pltpu.VMEM((tm_eff, E), jnp.float32)]),
            compiler_params=pltpu.CompilerParams(
                dimension_semantics=("parallel", "arbitrary"),
                vmem_limit_bytes=vmem_limit),
        )(g2d, l2d, prep.w1_g, prep.w1_l, prep.b1, prep.w2, prep.b2,
          prep.wg, prep.bg, prep.wl, prep.bl, prep.gamma, prep.beta)

    try:
        fused2d, gate2d = run(single_buffer_weights=True)
    except Exception:   # pragma: no cover — fallback if Buffered(1) is rejected
        fused2d, gate2d = run(single_buffer_weights=False)

    if n_pad != N:
        fused2d = fused2d[:N]
        gate2d = gate2d[:N]
    return fused2d.reshape(orig_shape), gate2d.reshape(orig_shape)


def init_params(key, embedding_dim, hidden_dim):
    """Deterministic synthetic parameters (PyTorch-style uniform fan-in init).
    Linear weights are stored as [in, out]."""
    ks = jax.random.split(key, 8)

    def linear(kw, kb, fan_in, fan_out):
        bound = 1.0 / jnp.sqrt(fan_in)
        w = jax.random.uniform(kw, (fan_in, fan_out), jnp.float32, -bound, bound)
        b = jax.random.uniform(kb, (1, fan_out), jnp.float32, -bound, bound)
        return w, b

    w1, b1 = linear(ks[0], ks[1], 2 * embedding_dim, hidden_dim)
    w2, b2 = linear(ks[2], ks[3], hidden_dim, embedding_dim)
    wg, bg = linear(ks[4], ks[5], embedding_dim, embedding_dim)
    wl, bl = linear(ks[6], ks[7], embedding_dim, embedding_dim)
    gamma = jnp.ones((1, embedding_dim), jnp.float32)   # nn.LayerNorm default
    beta = jnp.zeros((1, embedding_dim), jnp.float32)
    return (w1, b1, w2, b2, wg, bg, wl, bl, gamma, beta)


def fusion_gate_ref(global_repr, local_repr, params):
    """Pure-JAX reference (mirrors the PyTorch forward)."""
    w1, b1, w2, b2, wg, bg, wl, bl, gamma, beta = params
    concat = jnp.concatenate([global_repr, local_repr], axis=-1)
    gate = jax.nn.sigmoid(jnp.maximum(concat @ w1 + b1[0], 0.0) @ w2 + b2[0])
    gt = global_repr @ wg + bg[0]
    lt = local_repr @ wl + bl[0]
    fused = gate * gt + (1 - gate) * lt
    mean = jnp.mean(fused, axis=-1, keepdims=True)
    var = jnp.mean((fused - mean) ** 2, axis=-1, keepdims=True)
    fused = (fused - mean) * jax.lax.rsqrt(var + LN_EPS) * gamma[0] + beta[0]
    return fused, gate


if __name__ == "__main__":
    B, S, E, H = 2, 8, 32, 64   # batch, seq, embedding_dim, hidden_dim

    key = jax.random.PRNGKey(0)
    kp, kg, kl = jax.random.split(key, 3)
    params = init_params(kp, E, H)
    prep = prepare_params(params)   # one-time: split / cast / pad weights

    global_repr = jax.random.normal(kg, (B, S, E), jnp.float32)
    local_repr = jax.random.normal(kl, (B, S, E), jnp.float32)

    fused, gate = fusion_gate(global_repr, local_repr, prep)
    fused = jax.block_until_ready(fused)
    gate = jax.block_until_ready(gate)

    # sanity-check against pure-JAX reference
    fused_r, gate_r = fusion_gate_ref(global_repr, local_repr, params)
    assert fused.shape == (B, S, E) and gate.shape == (B, S, E)
    assert jnp.allclose(fused, fused_r, atol=2e-5, rtol=2e-5)
    assert jnp.allclose(gate, gate_r, atol=2e-5, rtol=2e-5)

    print("KERNEL_OK")
</pallas_src>

<mosaic_0001>
module attributes {stable_mosaic.version = 11 : i64} {
  func.func @fusion_gate_kernel(%arg0: i32, %arg1: i32, %arg2: memref<8x32xf32, #tpu.memory_space<vmem>>, %arg3: memref<8x32xf32, #tpu.memory_space<vmem>>, %arg4: memref<32x64xf32, #tpu.memory_space<vmem>>, %arg5: memref<32x64xf32, #tpu.memory_space<vmem>>, %arg6: memref<1x64xf32, #tpu.memory_space<vmem>>, %arg7: memref<64x32xf32, #tpu.memory_space<vmem>>, %arg8: memref<1x32xf32, #tpu.memory_space<vmem>>, %arg9: memref<32x32xf32, #tpu.memory_space<vmem>>, %arg10: memref<1x32xf32, #tpu.memory_space<vmem>>, %arg11: memref<32x32xf32, #tpu.memory_space<vmem>>, %arg12: memref<1x32xf32, #tpu.memory_space<vmem>>, %arg13: memref<1x32xf32, #tpu.memory_space<vmem>>, %arg14: memref<1x32xf32, #tpu.memory_space<vmem>>, %arg15: memref<8x32xf32, #tpu.memory_space<vmem>>, %arg16: memref<8x32xf32, #tpu.memory_space<vmem>>, %arg17: memref<8x32xf32, #tpu.memory_space<vmem>>) attributes {dimension_semantics = [#tpu.dimension_semantics<parallel>, #tpu.dimension_semantics<arbitrary>], iteration_bounds = array<i64: 2, 1>, scalar_prefetch = 0 : i64, scratch_operands = 1 : i64, tpu.core_type = #tpu.core_type<tc>, window_params = [{transform_indices = @transform_0, window_bounds = array<i64: 8, 32>}, {transform_indices = @transform_1, window_bounds = array<i64: 8, 32>}, {transform_indices = @transform_2, window_bounds = array<i64: 32, 64>}, {transform_indices = @transform_3, window_bounds = array<i64: 32, 64>}, {transform_indices = @transform_4, window_bounds = array<i64: 1, 64>}, {transform_indices = @transform_5, window_bounds = array<i64: 64, 32>}, {pipeline_mode = #tpu.pipeline_mode<synchronous>, transform_indices = @transform_6, window_bounds = array<i64: 1, 32>}, {pipeline_mode = #tpu.pipeline_mode<synchronous>, transform_indices = @transform_7, window_bounds = array<i64: 32, 32>}, {pipeline_mode = #tpu.pipeline_mode<synchronous>, transform_indices = @transform_8, window_bounds = array<i64: 1, 32>}, {pipeline_mode = #tpu.pipeline_mode<synchronous>, transform_indices = @transform_9, window_bounds = array<i64: 32, 32>}, {pipeline_mode = #tpu.pipeline_mode<synchronous>, transform_indices = @transform_10, window_bounds = array<i64: 1, 32>}, {pipeline_mode = #tpu.pipeline_mode<synchronous>, transform_indices = @transform_11, window_bounds = array<i64: 1, 32>}, {pipeline_mode = #tpu.pipeline_mode<synchronous>, transform_indices = @transform_12, window_bounds = array<i64: 1, 32>}, {transform_indices = @transform_13, window_bounds = array<i64: 8, 32>}, {transform_indices = @transform_14, window_bounds = array<i64: 8, 32>}]} {
    %c0 = arith.constant 0 : index
    %c0_0 = arith.constant 0 : index
    %0 = vector.load %arg2[%c0, %c0_0] : memref<8x32xf32, #tpu.memory_space<vmem>>, vector<8x32xf32>
    %c0_1 = arith.constant 0 : index
    %c0_2 = arith.constant 0 : index
    %1 = vector.load %arg3[%c0_1, %c0_2] : memref<8x32xf32, #tpu.memory_space<vmem>>, vector<8x32xf32>
    %c0_i32 = arith.constant 0 : i32
    %2 = arith.cmpi eq, %arg1, %c0_i32 : i32
    %3 = arith.extui %2 : i1 to i32
    %c0_i32_3 = arith.constant 0 : i32
    %4 = arith.cmpi ne, %3, %c0_i32_3 : i32
    scf.if %4 {
      %cst_21 = arith.constant 0.000000e+00 : f32
      %23 = vector.broadcast %cst_21 : f32 to vector<8x32xf32>
      %c0_22 = arith.constant 0 : index
      %c0_23 = arith.constant 0 : index
      %24 = vector.load %arg17[%c0_22, %c0_23] : memref<8x32xf32, #tpu.memory_space<vmem>>, vector<8x32xf32>
      tpu.vector_store %arg17[%c0_22, %c0_23], %23 {strides = array<i32>} : memref<8x32xf32, #tpu.memory_space<vmem>>, vector<8x32xf32>,
    } else {
    }
    %c0_4 = arith.constant 0 : index
    %c0_5 = arith.constant 0 : index
    %5 = vector.load %arg4[%c0_4, %c0_5] : memref<32x64xf32, #tpu.memory_space<vmem>>, vector<32x64xf32>
    %cst = arith.constant dense<0.000000e+00> : vector<8x64xf32>
    %6 = tpu.matmul %0, %5, %cst {dimension_numbers = #tpu.dot_dimension_numbers<[1], [0], [0], [1], [0, 0, 1, 1], [], []>} : vector<8x32xf32>, vector<32x64xf32>, vector<8x64xf32> -> vector<8x64xf32>
    %c0_6 = arith.constant 0 : index
    %c0_7 = arith.constant 0 : index
    %7 = vector.load %arg5[%c0_6, %c0_7] : memref<32x64xf32, #tpu.memory_space<vmem>>, vector<32x64xf32>
    %cst_8 = arith.constant dense<0.000000e+00> : vector<8x64xf32>
    %8 = tpu.matmul %1, %7, %cst_8 {dimension_numbers = #tpu.dot_dimension_numbers<[1], [0], [0], [1], [0, 0, 1, 1], [], []>} : vector<8x32xf32>, vector<32x64xf32>, vector<8x64xf32> -> vector<8x64xf32>
    %9 = arith.addf %6, %8 : vector<8x64xf32>
    %c0_9 = arith.constant 0 : index
    %c0_10 = arith.constant 0 : index
    %10 = vector.load %arg6[%c0_9, %c0_10] : memref<1x64xf32, #tpu.memory_space<vmem>>, vector<1x64xf32>
    %11 = vector.broadcast %10 : vector<1x64xf32> to vector<8x64xf32>
    %12 = arith.addf %9, %11 : vector<8x64xf32>
    %cst_11 = arith.constant 0.000000e+00 : f32
    %13 = vector.broadcast %cst_11 : f32 to vector<8x64xf32>
    %14 = arith.maximumf %12, %13 : vector<8x64xf32>
    %c0_12 = arith.constant 0 : index
    %c0_13 = arith.constant 0 : index
    %15 = vector.load %arg17[%c0_12, %c0_13] : memref<8x32xf32, #tpu.memory_space<vmem>>, vector<8x32xf32>
    %c0_14 = arith.constant 0 : index
    %c0_15 = arith.constant 0 : index
    %16 = vector.load %arg7[%c0_14, %c0_15] : memref<64x32xf32, #tpu.memory_space<vmem>>, vector<64x32xf32>
    %cst_16 = arith.constant dense<0.000000e+00> : vector<8x32xf32>
    %17 = tpu.matmul %14, %16, %cst_16 {dimension_numbers = #tpu.dot_dimension_numbers<[1], [0], [0], [1], [0, 0, 1, 1], [], []>} : vector<8x64xf32>, vector<64x32xf32>, vector<8x32xf32> -> vector<8x32xf32>
    %18 = arith.addf %15, %17 : vector<8x32xf32>
    %c0_17 = arith.constant 0 : index
    %c0_18 = arith.constant 0 : index
    %19 = vector.load %arg17[%c0_17, %c0_18] : memref<8x32xf32, #tpu.memory_space<vmem>>, vector<8x32xf32>
    tpu.vector_store %arg17[%c0_17, %c0_18], %18 {strides = array<i32>} : memref<8x32xf32, #tpu.memory_space<vmem>>, vector<8x32xf32>,
    %c0_i32_19 = arith.constant 0 : i32
    %20 = arith.cmpi eq, %arg1, %c0_i32_19 : i32
    %21 = arith.extui %20 : i1 to i32
    %c0_i32_20 = arith.constant 0 : i32
    %22 = arith.cmpi ne, %21, %c0_i32_20 : i32
    scf.if %22 {
      %c0_21 = arith.constant 0 : index
      %c0_22 = arith.constant 0 : index
      %23 = vector.load %arg17[%c0_21, %c0_22] : memref<8x32xf32, #tpu.memory_space<vmem>>, vector<8x32xf32>
      %c0_23 = arith.constant 0 : index
      %c0_24 = arith.constant 0 : index
      %24 = vector.load %arg8[%c0_23, %c0_24] : memref<1x32xf32, #tpu.memory_space<vmem>>, vector<1x32xf32>
      %25 = vector.broadcast %24 : vector<1x32xf32> to vector<8x32xf32>
      %26 = arith.addf %23, %25 : vector<8x32xf32>
      %27 = arith.negf %26 : vector<8x32xf32>
      %28 = math.exp %27 : vector<8x32xf32>
      %cst_25 = arith.constant 1.000000e+00 : f32
      %29 = vector.broadcast %cst_25 : f32 to vector<8x32xf32>
      %30 = arith.addf %29, %28 : vector<8x32xf32>
      %31 = arith.divf %29, %30 : vector<8x32xf32>
      %c0_26 = arith.constant 0 : index
      %c0_27 = arith.constant 0 : index
      %32 = vector.load %arg9[%c0_26, %c0_27] : memref<32x32xf32, #tpu.memory_space<vmem>>, vector<32x32xf32>
      %cst_28 = arith.constant dense<0.000000e+00> : vector<8x32xf32>
      %33 = tpu.matmul %0, %32, %cst_28 {dimension_numbers = #tpu.dot_dimension_numbers<[1], [0], [0], [1], [0, 0, 1, 1], [], []>} : vector<8x32xf32>, vector<32x32xf32>, vector<8x32xf32> -> vector<8x32xf32>
      %c0_29 = arith.constant 0 : index
      %c0_30 = arith.constant 0 : index
      %34 = vector.load %arg10[%c0_29, %c0_30] : memref<1x32xf32, #tpu.memory_space<vmem>>, vector<1x32xf32>
      %35 = vector.broadcast %34 : vector<1x32xf32> to vector<8x32xf32>
      %36 = arith.addf %33, %35 : vector<8x32xf32>
      %c0_31 = arith.constant 0 : index
      %c0_32 = arith.constant 0 : index
      %37 = vector.load %arg11[%c0_31, %c0_32] : memref<32x32xf32, #tpu.memory_space<vmem>>, vector<32x32xf32>
      %cst_33 = arith.constant dense<0.000000e+00> : vector<8x32xf32>
      %38 = tpu.matmul %1, %37, %cst_33 {dimension_numbers = #tpu.dot_dimension_numbers<[1], [0], [0], [1], [0, 0, 1, 1], [], []>} : vector<8x32xf32>, vector<32x32xf32>, vector<8x32xf32> -> vector<8x32xf32>
      %c0_34 = arith.constant 0 : index
      %c0_35 = arith.constant 0 : index
      %39 = vector.load %arg12[%c0_34, %c0_35] : memref<1x32xf32, #tpu.memory_space<vmem>>, vector<1x32xf32>
      %40 = vector.broadcast %39 : vector<1x32xf32> to vector<8x32xf32>
      %41 = arith.addf %38, %40 : vector<8x32xf32>
      %42 = arith.mulf %31, %36 : vector<8x32xf32>
      %cst_36 = arith.constant 1.000000e+00 : f32
      %43 = vector.broadcast %cst_36 : f32 to vector<8x32xf32>
      %44 = arith.subf %43, %31 : vector<8x32xf32>
      %45 = arith.mulf %44, %41 : vector<8x32xf32>
      %46 = arith.addf %42, %45 : vector<8x32xf32>
      %cst_37 = arith.constant dense<0.000000e+00> : vector<8xf32>
      %47 = vector.multi_reduction <add>, %46, %cst_37 [1] : vector<8x32xf32> to vector<8xf32>
      %48 = vector.shape_cast %47 : vector<8xf32> to vector<8x1xf32>
      %cst_38 = arith.constant 3.200000e+01 : f32
      %49 = vector.broadcast %cst_38 : f32 to vector<8x1xf32>
      %50 = arith.divf %48, %49 : vector<8x1xf32>
      %51 = vector.broadcast %50 : vector<8x1xf32> to vector<8x32xf32>
      %52 = arith.subf %46, %51 : vector<8x32xf32>
      %53 = arith.mulf %52, %52 : vector<8x32xf32>
      %cst_39 = arith.constant dense<0.000000e+00> : vector<8xf32>
      %54 = vector.multi_reduction <add>, %53, %cst_39 [1] : vector<8x32xf32> to vector<8xf32>
      %55 = vector.shape_cast %54 : vector<8xf32> to vector<8x1xf32>
      %cst_40 = arith.constant 3.200000e+01 : f32
      %56 = vector.broadcast %cst_40 : f32 to vector<8x1xf32>
      %57 = arith.divf %55, %56 : vector<8x1xf32>
      %cst_41 = arith.constant 9.99999974E-6 : f32
      %58 = vector.broadcast %cst_41 : f32 to vector<8x1xf32>
      %59 = arith.addf %57, %58 : vector<8x1xf32>
      %60 = math.rsqrt %59 : vector<8x1xf32>
      %61 = vector.broadcast %60 : vector<8x1xf32> to vector<8x32xf32>
      %62 = arith.mulf %52, %61 : vector<8x32xf32>
      %c0_42 = arith.constant 0 : index
      %c0_43 = arith.constant 0 : index
      %63 = vector.load %arg13[%c0_42, %c0_43] : memref<1x32xf32, #tpu.memory_space<vmem>>, vector<1x32xf32>
      %64 = vector.broadcast %63 : vector<1x32xf32> to vector<8x32xf32>
      %65 = arith.mulf %62, %64 : vector<8x32xf32>
      %c0_44 = arith.constant 0 : index
      %c0_45 = arith.constant 0 : index
      %66 = vector.load %arg14[%c0_44, %c0_45] : memref<1x32xf32, #tpu.memory_space<vmem>>, vector<1x32xf32>
      %67 = vector.broadcast %66 : vector<1x32xf32> to vector<8x32xf32>
      %68 = arith.addf %65, %67 : vector<8x32xf32>
      %c0_46 = arith.constant 0 : index
      %c0_47 = arith.constant 0 : index
      %69 = vector.load %arg15[%c0_46, %c0_47] : memref<8x32xf32, #tpu.memory_space<vmem>>, vector<8x32xf32>
      tpu.vector_store %arg15[%c0_46, %c0_47], %68 {strides = array<i32>} : memref<8x32xf32, #tpu.memory_space<vmem>>, vector<8x32xf32>,
      %c0_48 = arith.constant 0 : index
      %c0_49 = arith.constant 0 : index
      %70 = vector.load %arg16[%c0_48, %c0_49] : memref<8x32xf32, #tpu.memory_space<vmem>>, vector<8x32xf32>
      tpu.vector_store %arg16[%c0_48, %c0_49], %31 {strides = array<i32>} : memref<8x32xf32, #tpu.memory_space<vmem>>, vector<8x32xf32>,
    } else {
    }
    return
  }
  func.func @transform_0(%arg0: i32, %arg1: i32) -> (i32, i32) {
    %c0_i32 = arith.constant 0 : i32
    %c0_i32_0 = arith.constant 0 : i32
    return %arg0, %c0_i32 : i32, i32
  }
  func.func @transform_1(%arg0: i32, %arg1: i32) -> (i32, i32) {
    %c0_i32 = arith.constant 0 : i32
    %c0_i32_0 = arith.constant 0 : i32
    return %arg0, %c0_i32 : i32, i32
  }
  func.func @transform_2(%arg0: i32, %arg1: i32) -> (i32, i32) {
    %c0_i32 = arith.constant 0 : i32
    %c0_i32_0 = arith.constant 0 : i32
    return %c0_i32, %arg1 : i32, i32
  }
  func.func @transform_3(%arg0: i32, %arg1: i32) -> (i32, i32) {
    %c0_i32 = arith.constant 0 : i32
    %c0_i32_0 = arith.constant 0 : i32
    return %c0_i32, %arg1 : i32, i32
  }
  func.func @transform_4(%arg0: i32, %arg1: i32) -> (i32, i32) {
    %c0_i32 = arith.constant 0 : i32
    %c0_i32_0 = arith.constant 0 : i32
    return %c0_i32, %arg1 : i32, i32
  }
  func.func @transform_5(%arg0: i32, %arg1: i32) -> (i32, i32) {
    %c0_i32 = arith.constant 0 : i32
    %c0_i32_0 = arith.constant 0 : i32
    return %arg1, %c0_i32 : i32, i32
  }
  func.func @transform_6(%arg0: i32, %arg1: i32) -> (i32, i32) {
    %c0_i32 = arith.constant 0 : i32
    %c0_i32_0 = arith.constant 0 : i32
    %c0_i32_1 = arith.constant 0 : i32
    return %c0_i32, %c0_i32_0 : i32, i32
  }
  func.func @transform_7(%arg0: i32, %arg1: i32) -> (i32, i32) {
    %c0_i32 = arith.constant 0 : i32
    %c0_i32_0 = arith.constant 0 : i32
    %c0_i32_1 = arith.constant 0 : i32
    return %c0_i32, %c0_i32_0 : i32, i32
  }
  func.func @transform_8(%arg0: i32, %arg1: i32) -> (i32, i32) {
    %c0_i32 = arith.constant 0 : i32
    %c0_i32_0 = arith.constant 0 : i32
    %c0_i32_1 = arith.constant 0 : i32
    return %c0_i32, %c0_i32_0 : i32, i32
  }
  func.func @transform_9(%arg0: i32, %arg1: i32) -> (i32, i32) {
    %c0_i32 = arith.constant 0 : i32
    %c0_i32_0 = arith.constant 0 : i32
    %c0_i32_1 = arith.constant 0 : i32
    return %c0_i32, %c0_i32_0 : i32, i32
  }
  func.func @transform_10(%arg0: i32, %arg1: i32) -> (i32, i32) {
    %c0_i32 = arith.constant 0 : i32
    %c0_i32_0 = arith.constant 0 : i32
    %c0_i32_1 = arith.constant 0 : i32
    return %c0_i32, %c0_i32_0 : i32, i32
  }
  func.func @transform_11(%arg0: i32, %arg1: i32) -> (i32, i32) {
    %c0_i32 = arith.constant 0 : i32
    %c0_i32_0 = arith.constant 0 : i32
    %c0_i32_1 = arith.constant 0 : i32
    return %c0_i32, %c0_i32_0 : i32, i32
  }
  func.func @transform_12(%arg0: i32, %arg1: i32) -> (i32, i32) {
    %c0_i32 = arith.constant 0 : i32
    %c0_i32_0 = arith.constant 0 : i32
    %c0_i32_1 = arith.constant 0 : i32
    return %c0_i32, %c0_i32_0 : i32, i32
  }
  func.func @transform_13(%arg0: i32, %arg1: i32) -> (i32, i32) {
    %c0_i32 = arith.constant 0 : i32
    %c0_i32_0 = arith.constant 0 : i32
    return %arg0, %c0_i32 : i32, i32
  }
  func.func @transform_14(%arg0: i32, %arg1: i32) -> (i32, i32) {
    %c0_i32 = arith.constant 0 : i32
    %c0_i32_0 = arith.constant 0 : i32
    return %arg0, %c0_i32 : i32, i32
  }
}

module attributes {stable_mosaic.version = 11 : i64} {
  func.func @fusion_gate_kernel(%arg0: i32, %arg1: i32, %arg2: memref<8x32xf32, #tpu.memory_space<vmem>>, %arg3: memref<8x32xf32, #tpu.memory_space<vmem>>, %arg4: memref<32x64xf32, #tpu.memory_space<vmem>>, %arg5: memref<32x64xf32, #tpu.memory_space<vmem>>, %arg6: memref<1x64xf32, #tpu.memory_space<vmem>>, %arg7: memref<64x32xf32, #tpu.memory_space<vmem>>, %arg8: memref<1x32xf32, #tpu.memory_space<vmem>>, %arg9: memref<32x32xf32, #tpu.memory_space<vmem>>, %arg10: memref<1x32xf32, #tpu.memory_space<vmem>>, %arg11: memref<32x32xf32, #tpu.memory_space<vmem>>, %arg12: memref<1x32xf32, #tpu.memory_space<vmem>>, %arg13: memref<1x32xf32, #tpu.memory_space<vmem>>, %arg14: memref<1x32xf32, #tpu.memory_space<vmem>>, %arg15: memref<8x32xf32, #tpu.memory_space<vmem>>, %arg16: memref<8x32xf32, #tpu.memory_space<vmem>>, %arg17: memref<8x32xf32, #tpu.memory_space<vmem>>) attributes {dimension_semantics = [#tpu.dimension_semantics<parallel>, #tpu.dimension_semantics<arbitrary>], iteration_bounds = array<i64: 2, 1>, scalar_prefetch = 0 : i64, scratch_operands = 1 : i64, tpu.core_type = #tpu.core_type<tc>, window_params = [{transform_indices = @transform_0, window_bounds = array<i64: 8, 32>}, {transform_indices = @transform_1, window_bounds = array<i64: 8, 32>}, {transform_indices = @transform_2, window_bounds = array<i64: 32, 64>}, {transform_indices = @transform_3, window_bounds = array<i64: 32, 64>}, {transform_indices = @transform_4, window_bounds = array<i64: 1, 64>}, {transform_indices = @transform_5, window_bounds = array<i64: 64, 32>}, {pipeline_mode = #tpu.pipeline_mode<synchronous>, transform_indices = @transform_6, window_bounds = array<i64: 1, 32>}, {pipeline_mode = #tpu.pipeline_mode<synchronous>, transform_indices = @transform_7, window_bounds = array<i64: 32, 32>}, {pipeline_mode = #tpu.pipeline_mode<synchronous>, transform_indices = @transform_8, window_bounds = array<i64: 1, 32>}, {pipeline_mode = #tpu.pipeline_mode<synchronous>, transform_indices = @transform_9, window_bounds = array<i64: 32, 32>}, {pipeline_mode = #tpu.pipeline_mode<synchronous>, transform_indices = @transform_10, window_bounds = array<i64: 1, 32>}, {pipeline_mode = #tpu.pipeline_mode<synchronous>, transform_indices = @transform_11, window_bounds = array<i64: 1, 32>}, {pipeline_mode = #tpu.pipeline_mode<synchronous>, transform_indices = @transform_12, window_bounds = array<i64: 1, 32>}, {transform_indices = @transform_13, window_bounds = array<i64: 8, 32>}, {transform_indices = @transform_14, window_bounds = array<i64: 8, 32>}]} {
    %c0 = arith.constant 0 : index
    %c0_0 = arith.constant 0 : index
    %0 = vector.load %arg2[%c0, %c0_0] : memref<8x32xf32, #tpu.memory_space<vmem>>, vector<8x32xf32>
    %c0_1 = arith.constant 0 : index
    %c0_2 = arith.constant 0 : index
    %1 = vector.load %arg3[%c0_1, %c0_2] : memref<8x32xf32, #tpu.memory_space<vmem>>, vector<8x32xf32>
    %c0_i32 = arith.constant 0 : i32
    %2 = arith.cmpi eq, %arg1, %c0_i32 : i32
    %3 = arith.extui %2 : i1 to i32
    %c0_i32_3 = arith.constant 0 : i32
    %4 = arith.cmpi ne, %3, %c0_i32_3 : i32
    scf.if %4 {
      %cst_21 = arith.constant 0.000000e+00 : f32
      %23 = vector.broadcast %cst_21 : f32 to vector<8x32xf32>
      %c0_22 = arith.constant 0 : index
      %c0_23 = arith.constant 0 : index
      %24 = vector.load %arg17[%c0_22, %c0_23] : memref<8x32xf32, #tpu.memory_space<vmem>>, vector<8x32xf32>
      tpu.vector_store %arg17[%c0_22, %c0_23], %23 {strides = array<i32>} : memref<8x32xf32, #tpu.memory_space<vmem>>, vector<8x32xf32>,
    } else {
    }
    %c0_4 = arith.constant 0 : index
    %c0_5 = arith.constant 0 : index
    %5 = vector.load %arg4[%c0_4, %c0_5] : memref<32x64xf32, #tpu.memory_space<vmem>>, vector<32x64xf32>
    %cst = arith.constant dense<0.000000e+00> : vector<8x64xf32>
    %6 = tpu.matmul %0, %5, %cst {dimension_numbers = #tpu.dot_dimension_numbers<[1], [0], [0], [1], [0, 0, 1, 1], [], []>} : vector<8x32xf32>, vector<32x64xf32>, vector<8x64xf32> -> vector<8x64xf32>
    %c0_6 = arith.constant 0 : index
    %c0_7 = arith.constant 0 : index
    %7 = vector.load %arg5[%c0_6, %c0_7] : memref<32x64xf32, #tpu.memory_space<vmem>>, vector<32x64xf32>
    %cst_8 = arith.constant dense<0.000000e+00> : vector<8x64xf32>
    %8 = tpu.matmul %1, %7, %cst_8 {dimension_numbers = #tpu.dot_dimension_numbers<[1], [0], [0], [1], [0, 0, 1, 1], [], []>} : vector<8x32xf32>, vector<32x64xf32>, vector<8x64xf32> -> vector<8x64xf32>
    %9 = arith.addf %6, %8 : vector<8x64xf32>
    %c0_9 = arith.constant 0 : index
    %c0_10 = arith.constant 0 : index
    %10 = vector.load %arg6[%c0_9, %c0_10] : memref<1x64xf32, #tpu.memory_space<vmem>>, vector<1x64xf32>
    %11 = vector.broadcast %10 : vector<1x64xf32> to vector<8x64xf32>
    %12 = arith.addf %9, %11 : vector<8x64xf32>
    %cst_11 = arith.constant 0.000000e+00 : f32
    %13 = vector.broadcast %cst_11 : f32 to vector<8x64xf32>
    %14 = arith.maximumf %12, %13 : vector<8x64xf32>
    %c0_12 = arith.constant 0 : index
    %c0_13 = arith.constant 0 : index
    %15 = vector.load %arg17[%c0_12, %c0_13] : memref<8x32xf32, #tpu.memory_space<vmem>>, vector<8x32xf32>
    %c0_14 = arith.constant 0 : index
    %c0_15 = arith.constant 0 : index
    %16 = vector.load %arg7[%c0_14, %c0_15] : memref<64x32xf32, #tpu.memory_space<vmem>>, vector<64x32xf32>
    %cst_16 = arith.constant dense<0.000000e+00> : vector<8x32xf32>
    %17 = tpu.matmul %14, %16, %cst_16 {dimension_numbers = #tpu.dot_dimension_numbers<[1], [0], [0], [1], [0, 0, 1, 1], [], []>} : vector<8x64xf32>, vector<64x32xf32>, vector<8x32xf32> -> vector<8x32xf32>
    %18 = arith.addf %15, %17 : vector<8x32xf32>
    %c0_17 = arith.constant 0 : index
    %c0_18 = arith.constant 0 : index
    %19 = vector.load %arg17[%c0_17, %c0_18] : memref<8x32xf32, #tpu.memory_space<vmem>>, vector<8x32xf32>
    tpu.vector_store %arg17[%c0_17, %c0_18], %18 {strides = array<i32>} : memref<8x32xf32, #tpu.memory_space<vmem>>, vector<8x32xf32>,
    %c0_i32_19 = arith.constant 0 : i32
    %20 = arith.cmpi eq, %arg1, %c0_i32_19 : i32
    %21 = arith.extui %20 : i1 to i32
    %c0_i32_20 = arith.constant 0 : i32
    %22 = arith.cmpi ne, %21, %c0_i32_20 : i32
    scf.if %22 {
      %c0_21 = arith.constant 0 : index
      %c0_22 = arith.constant 0 : index
      %23 = vector.load %arg17[%c0_21, %c0_22] : memref<8x32xf32, #tpu.memory_space<vmem>>, vector<8x32xf32>
      %c0_23 = arith.constant 0 : index
      %c0_24 = arith.constant 0 : index
      %24 = vector.load %arg8[%c0_23, %c0_24] : memref<1x32xf32, #tpu.memory_space<vmem>>, vector<1x32xf32>
      %25 = vector.broadcast %24 : vector<1x32xf32> to vector<8x32xf32>
      %26 = arith.addf %23, %25 : vector<8x32xf32>
      %27 = arith.negf %26 : vector<8x32xf32>
      %28 = math.exp %27 : vector<8x32xf32>
      %cst_25 = arith.constant 1.000000e+00 : f32
      %29 = vector.broadcast %cst_25 : f32 to vector<8x32xf32>
      %30 = arith.addf %29, %28 : vector<8x32xf32>
      %31 = arith.divf %29, %30 : vector<8x32xf32>
      %c0_26 = arith.constant 0 : index
      %c0_27 = arith.constant 0 : index
      %32 = vector.load %arg9[%c0_26, %c0_27] : memref<32x32xf32, #tpu.memory_space<vmem>>, vector<32x32xf32>
      %cst_28 = arith.constant dense<0.000000e+00> : vector<8x32xf32>
      %33 = tpu.matmul %0, %32, %cst_28 {dimension_numbers = #tpu.dot_dimension_numbers<[1], [0], [0], [1], [0, 0, 1, 1], [], []>} : vector<8x32xf32>, vector<32x32xf32>, vector<8x32xf32> -> vector<8x32xf32>
      %c0_29 = arith.constant 0 : index
      %c0_30 = arith.constant 0 : index
      %34 = vector.load %arg10[%c0_29, %c0_30] : memref<1x32xf32, #tpu.memory_space<vmem>>, vector<1x32xf32>
      %35 = vector.broadcast %34 : vector<1x32xf32> to vector<8x32xf32>
      %36 = arith.addf %33, %35 : vector<8x32xf32>
      %c0_31 = arith.constant 0 : index
      %c0_32 = arith.constant 0 : index
      %37 = vector.load %arg11[%c0_31, %c0_32] : memref<32x32xf32, #tpu.memory_space<vmem>>, vector<32x32xf32>
      %cst_33 = arith.constant dense<0.000000e+00> : vector<8x32xf32>
      %38 = tpu.matmul %1, %37, %cst_33 {dimension_numbers = #tpu.dot_dimension_numbers<[1], [0], [0], [1], [0, 0, 1, 1], [], []>} : vector<8x32xf32>, vector<32x32xf32>, vector<8x32xf32> -> vector<8x32xf32>
      %c0_34 = arith.constant 0 : index
      %c0_35 = arith.constant 0 : index
      %39 = vector.load %arg12[%c0_34, %c0_35] : memref<1x32xf32, #tpu.memory_space<vmem>>, vector<1x32xf32>
      %40 = vector.broadcast %39 : vector<1x32xf32> to vector<8x32xf32>
      %41 = arith.addf %38, %40 : vector<8x32xf32>
      %42 = arith.mulf %31, %36 : vector<8x32xf32>
      %cst_36 = arith.constant 1.000000e+00 : f32
      %43 = vector.broadcast %cst_36 : f32 to vector<8x32xf32>
      %44 = arith.subf %43, %31 : vector<8x32xf32>
      %45 = arith.mulf %44, %41 : vector<8x32xf32>
      %46 = arith.addf %42, %45 : vector<8x32xf32>
      %cst_37 = arith.constant dense<0.000000e+00> : vector<8xf32>
      %47 = vector.multi_reduction <add>, %46, %cst_37 [1] : vector<8x32xf32> to vector<8xf32>
      %48 = vector.shape_cast %47 : vector<8xf32> to vector<8x1xf32>
      %cst_38 = arith.constant 3.200000e+01 : f32
      %49 = vector.broadcast %cst_38 : f32 to vector<8x1xf32>
      %50 = arith.divf %48, %49 : vector<8x1xf32>
      %51 = vector.broadcast %50 : vector<8x1xf32> to vector<8x32xf32>
      %52 = arith.subf %46, %51 : vector<8x32xf32>
      %53 = arith.mulf %52, %52 : vector<8x32xf32>
      %cst_39 = arith.constant dense<0.000000e+00> : vector<8xf32>
      %54 = vector.multi_reduction <add>, %53, %cst_39 [1] : vector<8x32xf32> to vector<8xf32>
      %55 = vector.shape_cast %54 : vector<8xf32> to vector<8x1xf32>
      %cst_40 = arith.constant 3.200000e+01 : f32
      %56 = vector.broadcast %cst_40 : f32 to vector<8x1xf32>
      %57 = arith.divf %55, %56 : vector<8x1xf32>
      %cst_41 = arith.constant 9.99999974E-6 : f32
      %58 = vector.broadcast %cst_41 : f32 to vector<8x1xf32>
      %59 = arith.addf %57, %58 : vector<8x1xf32>
      %60 = math.rsqrt %59 : vector<8x1xf32>
      %61 = vector.broadcast %60 : vector<8x1xf32> to vector<8x32xf32>
      %62 = arith.mulf %52, %61 : vector<8x32xf32>
      %c0_42 = arith.constant 0 : index
      %c0_43 = arith.constant 0 : index
      %63 = vector.load %arg13[%c0_42, %c0_43] : memref<1x32xf32, #tpu.memory_space<vmem>>, vector<1x32xf32>
      %64 = vector.broadcast %63 : vector<1x32xf32> to vector<8x32xf32>
      %65 = arith.mulf %62, %64 : vector<8x32xf32>
      %c0_44 = arith.constant 0 : index
      %c0_45 = arith.constant 0 : index
      %66 = vector.load %arg14[%c0_44, %c0_45] : memref<1x32xf32, #tpu.memory_space<vmem>>, vector<1x32xf32>
      %67 = vector.broadcast %66 : vector<1x32xf32> to vector<8x32xf32>
      %68 = arith.addf %65, %67 : vector<8x32xf32>
      %c0_46 = arith.constant 0 : index
      %c0_47 = arith.constant 0 : index
      %69 = vector.load %arg15[%c0_46, %c0_47] : memref<8x32xf32, #tpu.memory_space<vmem>>, vector<8x32xf32>
      tpu.vector_store %arg15[%c0_46, %c0_47], %68 {strides = array<i32>} : memref<8x32xf32, #tpu.memory_space<vmem>>, vector<8x32xf32>,
      %c0_48 = arith.constant 0 : index
      %c0_49 = arith.constant 0 : index
      %70 = vector.load %arg16[%c0_48, %c0_49] : memref<8x32xf32, #tpu.memory_space<vmem>>, vector<8x32xf32>
      tpu.vector_store %arg16[%c0_48, %c0_49], %31 {strides = array<i32>} : memref<8x32xf32, #tpu.memory_space<vmem>>, vector<8x32xf32>,
    } else {
    }
    return
  }
  func.func @transform_0(%arg0: i32, %arg1: i32) -> (i32, i32) {
    %c0_i32 = arith.constant 0 : i32
    %c0_i32_0 = arith.constant 0 : i32
    return %arg0, %c0_i32 : i32, i32
  }
  func.func @transform_1(%arg0: i32, %arg1: i32) -> (i32, i32) {
    %c0_i32 = arith.constant 0 : i32
    %c0_i32_0 = arith.constant 0 : i32
    return %arg0, %c0_i32 : i32, i32
  }
  func.func @transform_2(%arg0: i32, %arg1: i32) -> (i32, i32) {
    %c0_i32 = arith.constant 0 : i32
    %c0_i32_0 = arith.constant 0 : i32
    return %c0_i32, %arg1 : i32, i32
  }
  func.func @transform_3(%arg0: i32, %arg1: i32) -> (i32, i32) {
    %c0_i32 = arith.constant 0 : i32
    %c0_i32_0 = arith.constant 0 : i32
    return %c0_i32, %arg1 : i32, i32
  }
  func.func @transform_4(%arg0: i32, %arg1: i32) -> (i32, i32) {
    %c0_i32 = arith.constant 0 : i32
    %c0_i32_0 = arith.constant 0 : i32
    return %c0_i32, %arg1 : i32, i32
  }
  func.func @transform_5(%arg0: i32, %arg1: i32) -> (i32, i32) {
    %c0_i32 = arith.constant 0 : i32
    %c0_i32_0 = arith.constant 0 : i32
    return %arg1, %c0_i32 : i32, i32
  }
  func.func @transform_6(%arg0: i32, %arg1: i32) -> (i32, i32) {
    %c0_i32 = arith.constant 0 : i32
    %c0_i32_0 = arith.constant 0 : i32
    %c0_i32_1 = arith.constant 0 : i32
    return %c0_i32, %c0_i32_0 : i32, i32
  }
  func.func @transform_7(%arg0: i32, %arg1: i32) -> (i32, i32) {
    %c0_i32 = arith.constant 0 : i32
    %c0_i32_0 = arith.constant 0 : i32
    %c0_i32_1 = arith.constant 0 : i32
    return %c0_i32, %c0_i32_0 : i32, i32
  }
  func.func @transform_8(%arg0: i32, %arg1: i32) -> (i32, i32) {
    %c0_i32 = arith.constant 0 : i32
    %c0_i32_0 = arith.constant 0 : i32
    %c0_i32_1 = arith.constant 0 : i32
    return %c0_i32, %c0_i32_0 : i32, i32
  }
  func.func @transform_9(%arg0: i32, %arg1: i32) -> (i32, i32) {
    %c0_i32 = arith.constant 0 : i32
    %c0_i32_0 = arith.constant 0 : i32
    %c0_i32_1 = arith.constant 0 : i32
    return %c0_i32, %c0_i32_0 : i32, i32
  }
  func.func @transform_10(%arg0: i32, %arg1: i32) -> (i32, i32) {
    %c0_i32 = arith.constant 0 : i32
    %c0_i32_0 = arith.constant 0 : i32
    %c0_i32_1 = arith.constant 0 : i32
    return %c0_i32, %c0_i32_0 : i32, i32
  }
  func.func @transform_11(%arg0: i32, %arg1: i32) -> (i32, i32) {
    %c0_i32 = arith.constant 0 : i32
    %c0_i32_0 = arith.constant 0 : i32
    %c0_i32_1 = arith.constant 0 : i32
    return %c0_i32, %c0_i32_0 : i32, i32
  }
  func.func @transform_12(%arg0: i32, %arg1: i32) -> (i32, i32) {
    %c0_i32 = arith.constant 0 : i32
    %c0_i32_0 = arith.constant 0 : i32
    %c0_i32_1 = arith.constant 0 : i32
    return %c0_i32, %c0_i32_0 : i32, i32
  }
  func.func @transform_13(%arg0: i32, %arg1: i32) -> (i32, i32) {
    %c0_i32 = arith.constant 0 : i32
    %c0_i32_0 = arith.constant 0 : i32
    return %arg0, %c0_i32 : i32, i32
  }
  func.func @transform_14(%arg0: i32, %arg1: i32) -> (i32, i32) {
    %c0_i32 = arith.constant 0 : i32
    %c0_i32_0 = arith.constant 0 : i32
    return %arg0, %c0_i32 : i32, i32
  }
}

</mosaic_0001>

<bundles_post_ra>
// kernel: tpu_custom_call.1
= control target key start
LH: loop header
LB: loop body
LE: loop exit
PB: predicated region body
PF: predicated region fallthrough
CT: control target
= control target key end

     0   :  { %s2286_s0 = inlined_call_operand.hbm [shape: f32[16,32], index: 0, kind: input, shape index: {}]   ;;  %s2287_s1 = inlined_call_operand.hbm [shape: f32[16,32], index: 1, kind: input, shape index: {}]   ;;  %s2288_s2 = inlined_call_operand.vmem [shape: f32[32,64], index: 2, kind: input, shape index: {}]   ;;  %s2289_s3 = inlined_call_operand.vmem [shape: f32[32,64], index: 3, kind: input, shape index: {}]   ;;  %s2290_s4 = inlined_call_operand.vmem [shape: f32[1,64], index: 4, kind: input, shape index: {}]   ;;  %s2291_s5 = inlined_call_operand.vmem [shape: f32[64,32], index: 5, kind: input, shape index: {}]   ;;  %s2292_s6 = inlined_call_operand.vmem [shape: f32[1,32], index: 6, kind: input, shape index: {}]   ;;  %s2293_s7 = inlined_call_operand.vmem [shape: f32[32,32], index: 7, kind: input, shape index: {}]   ;;  %s2294_s8 = inlined_call_operand.hbm [shape: f32[1,32], index: 8, kind: input, shape index: {}]   ;;  %s2295_s9 = inlined_call_operand.vmem [shape: f32[32,32], index: 9, kind: input, shape index: {}]   ;;  %s2296_s10 = inlined_call_operand.vmem [shape: f32[1,32], index: 10, kind: input, shape index: {}]   ;;  %s2297_s11 = inlined_call_operand.vmem [shape: f32[1,32], index: 11, kind: input, shape index: {}]   ;;  %s2298_s12 = inlined_call_operand.vmem [shape: f32[1,32], index: 12, kind: input, shape index: {}]   ;;  %s2299_s13 = inlined_call_operand.hbm [shape: f32[16,32], index: 13, kind: output, shape index: {0}]   ;;  %s2300_s14 = inlined_call_operand.hbm [shape: f32[16,32], index: 14, kind: output, shape index: {1}]  }
   0x1   :  { %2315 = sst [smem:[#allocation25_spill]] %s2294_s8 }
   0x2   :  { %2316 = sst [smem:[#allocation26_spill]] %s2297_s11 }
   0x3   :  { %2317 = sst [smem:[#allocation27_spill]] %s2298_s12 }
   0x4   :  { %2318 = sst [smem:[#allocation28_spill]] %s2299_s13 }
   0x5   :  { %2319 = sst [smem:[#allocation29_spill]] %s2300_s14 }
   0x6   :  { %20 = vsyncpa [#allocation4], 0 }
   0x7   :  { %22 = vsyncpa [#allocation4 + $0x1], 0 }
   0x8   :  { %23 = vsyncpa [#allocation7], 0 }
   0x9   :  { %25 = vsyncpa [#allocation7 + $0x1], 0 }
   0xa   :  { %26 = vsyncpa [#allocation5], 0 }
   0xb   :  { %28 = vsyncpa [#allocation5 + $0x1], 0 }
   0xc   :  { %29 = vsyncpa [#allocation11], 0 }
   0xd   :  { %31 = vsyncpa [#allocation11 + $0x1], 0  ;;  %s1881_s29 = smov 0   ;;  %s1883_s30 = smov 0  }
   0xe   :  { %s1885_s15 = smov 0   ;;  %s1887_s16 = smov 0  }
   0xf   :  { %s1889_s17 = smov 0   ;;  %s1891_s18 = smov 0  }
  0x10 LB: > { %2320 = sst [smem:[#allocation17_spill]] %s1776_s29  ;;  %s1912_s19 = sadd.s32 4294967295, %s1796_s18   ;;  %s1796_s18 = sphi %s1891_s18, %s37_s18   ;;  %s1792_s17 = sphi %s1889_s17, %s2357_s17   ;;  %s1788_s16 = sphi %s1887_s16, %s2360_s16   ;;  %s1784_s15 = sphi %s1885_s15, %s2355_s15   ;;  %s1780_s30 = sphi %s1883_s30, %s2359_s30   ;;  %s1776_s29 = sphi %s1881_s29, %s2358_s29  }
  0x11   : > { %2321 = sst [smem:[#allocation18_spill]] %s1784_s15  ;;  %s1330_s20 = sadd.s32 4294967294, %s1796_s18  }
  0x12   : > { %2322 = sst [smem:[#allocation19_spill]] %s1788_s16  ;;  %p69_p0 = scmp.ne.s32.totalorder %s1780_s30, %s1776_s29 }
  0x13   : > { %2323 = sst [smem:[#allocation20_spill]] %s1792_s17  ;;  %p2305_p1 = scmp.eq.s32.totalorder %s1912_s19, 0 }
  0x14   : > { %p376_p3 = scmp.eq.s32.totalorder %s1330_s20, 1  ;;  %p1331_p5 = scmp.ge.s32.totalorder %s1796_s18, 1 }
  0x15   : > { %p1921_p4 = por %p2305_p1, %p69_p0  ;;  %p409_p7 = scmp.lt.s32.totalorder %s1796_s18, 3 }
  0x16   : > { %p1926_p6 = por %p376_p3, %p69_p0  ;;  %s1798_s24 = smov [#allocation8]  }
  0x17   : > { %s2324_s21 = scalar_select %p1921_p4, 1, 0 }
  0x18   : > { %s2325_s22 = scalar_select %p1926_p6, 1, 0 }
  0x19   : > { %p1931_p8 = pnand %p1331_p5, %p409_p7  ;;  %s457_s25 = sshll.u32 %s1798_s24, 4  ;;  %s458_s25 = int_to_ptr.vmem [resolvable:$true] %s457_s25 }
  0x1a   : > { %2326 = sst [smem:[#allocation21_spill]] %s2325_s22  ;;  %s49_s27 = sadd.s32 1, %s1792_s17 }
  0x1b   : > { %s2327_s23 = scalar_select %p1931_p8, 1, 0 }
  0x1c   : > { %p1506_p10 = pneg %p1931_p8  ;;  %p1946_p12 = scmp.ge.s32.totalorder %s49_s27, 2 }
  0x1d   : > { %s2330_s8 = sld [smem:[#allocation25_spill]] }
  0x1e   : > { %p1940_p11 = pnand %p1506_p10, %p2305_p1 }
  0x1f   : > { %s2329_s20 = scalar_select %p1946_p12, 1, 0 }
  0x20   : > { %p1588_p0 = pneg %p1940_p11 }
  0x23   : > { %s1586_s24 = scalar_lea.hbm %s2330_s8, 16 }
  0x24   : > { %p1587_p13 = scmp.ne.s32.totalorder %s2330_s8, %s1586_s24  ;;  %p1593_p7 = scmp.lt.u32.totalorder %s1586_s24, %s2330_s8 }
  0x26   : > { %p1589_p3 = pnand %p1588_p0, %p1587_p13 }
  0x28   : > { %p1590_p5 = pneg %p1589_p3 }
  0x2a   : > { %p1595_p10 = pnand %p1593_p7, %p1590_p5 }
  0x2c   : > { %1598 = shalt.err (!%p1595_p10)
}
  0x2d   : > { %s1599_s28 = scalar_lea.vmem %s458_s25, 16  ;;  %s1606_s29 = scalar_lea.vmem %s458_s25, 32 }
  0x2e   : > { %p1600_p9 = scmp.ne.s32.totalorder %s458_s25, %s1599_s28  ;;  %p1607_p6 = scmp.lt.s32.totalorder %s458_s25, %s458_s25 }
  0x2f   : > { %p1608_p4 = scmp.lt.s32.totalorder %s1606_s29, %s1599_s28 }
  0x30   : > { %p1602_p1 = pnand %p1600_p9, %p1588_p0 }
  0x31   : > { %p1609_p8 = por %p1608_p4, %p1607_p6 }
  0x32   : > { %p1603_p2 = pneg %p1602_p1 }
  0x34   : > { %p1610_p12 = pnand %p1609_p8, %p1603_p2 }
  0x36   : > { %1613 = shalt.err (!%p1610_p12)
}
  0x37   : > { %1509 = dma.hbm_to_vmem [thread:$0]  (!%p1940_p11), %s2330_s8, 16, %s458_s25, [#allocation7]  }
  0x38   : > { %p2331_p1 = scmp.ne.s32.totalorder %s2329_s20, 0  ;;  %p63_p2 = scmp.ne.s32.totalorder %s1784_s15, %s1780_s30 }
  0x39   : > { %p64_p4 = scmp.eq.s32.totalorder %s1796_s18, 0  ;;  %p1525_p6 = scmp.lt.s32.totalorder %s1796_s18, 2 }
  0x3a   : > { %s2362_s27 = smov (%p2331_p1, %s49_s27), 0  ;;  %p2333_p12 = scmp.eq.s32.totalorder %s1912_s19, 1 }
  0x3b   : > { %2332 = sst [smem:[#allocation22_spill]] %s2362_s27  ;;  %s53_s11 = ssub.s32 %s1792_s17, %s2362_s27 }
  0x3c   : > { %p54_p8 = scmp.eq.s32.totalorder %s53_s11, 0  ;;  %p65_p9 = por %p64_p4, %p63_p2 }
  0x3d   : > { %p1978_p13 = por %p2333_p12, %p63_p2  ;;  %s480_s22 = sand.u32 1, %s1784_s15  }
  0x3e   : > { %s2336_s26 = sadd.s32 1, %s1784_s15  ;;  %s1988_s25 = sshll.u32 %s480_s22, 3 }
  0x3f   : > { %s2334_s14 = scalar_select %p1978_p13, 1, 0 }
  0x40   : > { %s1986_s28 = scalar_select %p54_p8, %s1784_s15, %s2336_s26  }
  0x41   : > { %2335 = sst [smem:[#allocation23_spill]] %s2334_s14  ;;  %s1339_s20 = sshll.u32 %s1792_s17, 7 }
  0x42   : > { %2337 = sst [smem:[#allocation24_spill]] %s1986_s28  ;;  %s1994_s12 = scalar_lea.hbm %s2286_s0, %s1339_s20 }
  0x43   : > { %s484_s13 = scalar_lea.vmem [#allocation3], %s1988_s25  ;;  %p1999_p11 = pnand %p1525_p6, %p65_p9 }
  0x44   : > { %s491_s11 = sshll.u32 %s484_s13, 4  ;;  %s2006_s24 = scalar_lea.hbm %s2287_s1, %s1339_s20  ;;  %s1997_s11 = int_to_ptr.vmem [resolvable:$true] %s491_s11 }
  0x45   : > { %s498_s29 = sand.u32 1, %s1796_s18   ;;  %s481_s17 = scalar_lea.sflag [#allocation4], %s480_s22 }
  0x46   : > { %s1614_s28 = scalar_lea.hbm %s1994_s12, 128  ;;  %p1616_p3 = pneg %p1999_p11 }
  0x47   : > { %p1615_p0 = scmp.ne.s32.totalorder %s1994_s12, %s1614_s28  ;;  %s1619_s14 = scalar_lea.hbm %s2286_s0, 256 }
  0x48   : > { %p1620_p10 = scmp.lt.u32.totalorder %s1994_s12, %s2286_s0  ;;  %p1621_p1 = scmp.lt.u32.totalorder %s1619_s14, %s1614_s28 }
  0x49   : > { %p1617_p5 = pnand %p1616_p3, %p1615_p0  ;;  %p1623_p4 = scmp.lt.u32.totalorder %s1614_s28, %s1994_s12 }
  0x4a   : > { %p1622_p2 = por %p1621_p1, %p1620_p10 }
  0x4b   : > { %p1618_p7 = pneg %p1617_p5 }
  0x4c   : > { %p1624_p6 = por %p1623_p4, %p1622_p2 }
  0x4e   : > { %p1625_p8 = pnand %p1624_p6, %p1618_p7 }
  0x50   : > { %1628 = shalt.err (!%p1625_p8)
}
  0x51   : > { %s1629_s27 = scalar_lea.vmem %s1997_s11, 128  ;;  %s1799_s15 = smov [#allocation3]  }
  0x52   : > { %p1630_p9 = scmp.ne.s32.totalorder %s1997_s11, %s1629_s27  ;;  %s1634_s22 = sshll.u32 %s1799_s15, 4  ;;  %s1635_s22 = int_to_ptr.vmem [resolvable:$false] %s1634_s22 }
  0x53   : > { %s1636_s16 = scalar_lea.vmem %s1635_s22, 256  ;;  %p1637_p5 = scmp.lt.s32.totalorder %s1997_s11, %s1635_s22 }
  0x54   : > { %p1632_p12 = pnand %p1630_p9, %p1616_p3  ;;  %p1638_p10 = scmp.lt.s32.totalorder %s1636_s16, %s1629_s27 }
  0x56   : > { %p1633_p0 = pneg %p1632_p12  ;;  %p1639_p1 = por %p1638_p10, %p1637_p5 }
  0x58   : > { %p1640_p2 = pnand %p1639_p1, %p1633_p0 }
  0x5a   : > { %1643 = shalt.err (!%p1640_p2)
}
  0x5b   : > { %1513 = dma.hbm_to_vmem [thread:$0]  (!%p1999_p11), %s1994_s12, 128, %s1997_s11, %s481_s17  }
  0x5c   : > { %s502_s14 = scalar_lea.vmem [#allocation6], %s1988_s25  ;;  %s499_s20 = scalar_lea.sflag [#allocation7], %s498_s29 }
  0x5d   : > { %s509_s28 = sshll.u32 %s502_s14, 4  ;;  %s1644_s13 = scalar_lea.hbm %s2006_s24, 128  ;;  %s510_s28 = int_to_ptr.vmem [resolvable:$true] %s509_s28 }
  0x5e   : > { %p1645_p7 = scmp.ne.s32.totalorder %s2006_s24, %s1644_s13  ;;  %s1649_s15 = scalar_lea.hbm %s2287_s1, 256 }
  0x5f   : > { %p1650_p8 = scmp.lt.u32.totalorder %s2006_s24, %s2287_s1  ;;  %p1651_p9 = scmp.lt.u32.totalorder %s1649_s15, %s1644_s13 }
  0x60   : > { %p1647_p4 = pnand %p1645_p7, %p1616_p3  ;;  %p1653_p0 = scmp.lt.u32.totalorder %s1644_s13, %s2006_s24 }
  0x61   : > { %p1652_p12 = por %p1651_p9, %p1650_p8 }
  0x62   : > { %p1648_p6 = pneg %p1647_p4 }
  0x63   : > { %p1654_p5 = por %p1653_p0, %p1652_p12 }
  0x65   : > { %p1655_p10 = pnand %p1654_p5, %p1648_p6 }
  0x67   : > { %1658 = shalt.err (!%p1655_p10)
}
  0x68   : > { %s1659_s17 = scalar_lea.vmem %s510_s28, 128  ;;  %s1800_s25 = smov [#allocation6]  }
  0x69   : > { %p1660_p1 = scmp.ne.s32.totalorder %s510_s28, %s1659_s17  ;;  %s1664_s12 = sshll.u32 %s1800_s25, 4  ;;  %s1665_s12 = int_to_ptr.vmem [resolvable:$false] %s1664_s12 }
  0x6a   : > { %s1666_s11 = scalar_lea.vmem %s1665_s12, 256  ;;  %p1667_p4 = scmp.lt.s32.totalorder %s510_s28, %s1665_s12 }
  0x6b   : > { %p1662_p2 = pnand %p1660_p1, %p1616_p3  ;;  %p1668_p13 = scmp.lt.s32.totalorder %s1666_s11, %s1659_s17 }
  0x6d   : > { %p1663_p7 = pneg %p1662_p2  ;;  %p1669_p8 = por %p1668_p13, %p1667_p4 }
  0x6f   : > { %p1670_p9 = pnand %p1669_p8, %p1663_p7 }
  0x71   : > { %1673 = shalt.err (!%p1670_p9)
}
  0x72   : > { %1516 = dma.hbm_to_vmem [thread:$0]  (!%p1999_p11), %s2006_s24, 128, %s510_s28, %s499_s20  }
  0x73   : > { %p2339_p6 = scmp.ne.s32.totalorder %s2327_s23, 0 }
  0x74   : > { %s2059_s29 = sand.u32 (!%p2339_p6), 1, %s1780_s30   ;;  %p2340_p13 = scmp.ne.s32.totalorder (!%p2339_p6), %s2324_s21, 0 }
  0x75   : > { %518 = sbr.rel (%p2339_p6) target bundleno = 943 (0x3af), region = 72  ;;  %s2062_s14 = sshll.u32 (!%p2339_p6), %s2059_s29, 3 }
  0x76   : > { %s521_s13 = scalar_lea.sflag (!%p2339_p6), [#allocation4], %s2059_s29  ;;  %s524_s8 = scalar_lea.vmem (!%p2339_p6), [#allocation3], %s2062_s14 }
  0x7c   : > { %1755 = dma.done.wait (%p2340_p13), %s521_s13, 128  }
  0x7d   : > { %1757 = vsyncadd (%p2340_p13), %s521_s13, 4294967168  ;;  %s529_s23 = sand.u32 1, %s1912_s19   ;;  %s533_s24 = scalar_lea.vmem [#allocation6], %s2062_s14 }
  0x7e   : > { %s530_s26 = scalar_lea.sflag [#allocation7], %s529_s23 }
  0x7f   : > { %1759 = dma.done.wait (%p2340_p13), %s530_s26, 128  }
  0x80   : > { %1761 = vsyncadd (%p2340_p13), %s530_s26, 4294967168  ;;  %p2341_p11 = scmp.eq.s32.totalorder %s1912_s19, 0 }
  0x82   : > { %1763 = dma.done.wait (%p2341_p11), [#allocation7], 16   ;;  %p2342_p3 = pmov %p2341_p11 }
  0x83   : > { %vm631_vm0 = vcmask 261120   ;;  %v1801_v0 = vmov 0.0|0.0   ;;  %v1802_v1 = vmov 0.0   ;;  %vm1803_vm1 = vmmov 0   ;;  %v637_v2 = vld [vmem:[%s2289_s3] sm:$0xff]  ;;  %v638_v3 = vld [vmem:[%s2289_s3 + $0x8] sm:$0xff] }
  0x84   : > { %1765 = vsyncadd (%p2342_p3), [#allocation7], 4294967280  ;;  %1458 = vmatprep.subr.bf16.mxu0 %v1801_v0  ;;  %1464 = vmatprep.subr.bf16.mxu1 %v1801_v0  ;;  %632 = vst.msk [vmem:[#allocation2] sm:$0xff] %vm631_vm0, %v1802_v1  ;;  %v633_v4 = vld [vmem:[%s2288_s2] sm:$0xff]  ;;  %v1459_v5 = vpack.c.bf16 %v638_v3, %v637_v2  ;;  %v634_v6 = vld [vmem:[%s2288_s2 + $0x8] sm:$0xff]  ;;  %vm806_vm2 = vcmask 523264  }
  0x85   : > { %1403 = vmatprep.mubr.msk.f32.mxu0 %vm1803_vm1, %v1802_v1  ;;  %1414 = vmatprep.mubr.msk.f32.mxu1 %vm1803_vm1, %v1802_v1  ;;  %v639_v7 = vld [vmem:[%s2289_s3 + $0x10] sm:$0xff]  ;;  %v640_v8 = vld [vmem:[%s2289_s3 + $0x18] sm:$0xff]  ;;  %v1465_v9 = vpack.c.bf16 %v634_v6, %v633_v4  ;;  %v798_v14 = vld [vmem:[%s2291_s5] sm:$0xff]  ;;  %s2343_s15 = sld [smem:[#allocation19_spill]]  ;;  %s607_s22 = scalar_lea.vmem [#allocation10], %s2062_s14 }
  0x86   : > { %v635_v10 = vld [vmem:[%s2288_s2 + $0x10] sm:$0xff]  ;;  %v636_v11 = vld [vmem:[%s2288_s2 + $0x18] sm:$0xff]  ;;  %1460 = vmatpush3.bf16.msra.mxu0 %v1459_v5  ;;  %v1462_v12 = vpack.c.bf16 %v640_v8, %v639_v7  ;;  %v799_v15 = vld [vmem:[%s2291_s5 + $0x8] sm:$0xff]  ;;  %s2344_s16 = sld [smem:[#allocation23_spill]]  ;;  %s1130_s11 = sshll.u32 %s607_s22, 4  ;;  %s1131_s11 = int_to_ptr.vmem [resolvable:$true] %s1130_s11 }
  0x87   : > { %1466 = vmatpush3.bf16.msra.mxu1 %v1465_v9  ;;  %1461 = vmatprep.subr.bf16.mxu0 %v1801_v0  ;;  %v1468_v13 = vpack.c.bf16 %v636_v11, %v635_v10  ;;  %v626_v16 = vld [vmem:[%s533_s24] sm:$0xff]  ;;  %v1471_v17 = vpack.c.bf16 %v799_v15, %v798_v14  ;;  %v625_v18 = vld [vmem:[%s524_s8] sm:$0xff]  ;;  %s2345_s25 = sld [smem:[#allocation29_spill]]  ;;  %s1104_s13 = scalar_lea.sflag [#allocation11], %s2059_s29 }
  0x88   : > { %1467 = vmatprep.subr.bf16.mxu1 %v1801_v0  ;;  %v800_v19 = vld [vmem:[%s2291_s5 + $0x10] sm:$0xff]  ;;  %v801_v20 = vld [vmem:[%s2291_s5 + $0x18] sm:$0xff]  ;;  %v802_v22 = vld [vmem:[%s2291_s5 + $0x20] sm:$0xff]  ;;  %s1674_s23 = scalar_lea.vmem %s1131_s11, 128  ;;  %s1804_s26 = smov [#allocation10]  }
  0x89   : > { %v1474_v21 = vpack.c.bf16 %v801_v20, %v800_v19  ;;  %v803_v23 = vld [vmem:[%s2291_s5 + $0x28] sm:$0xff]  ;;  %v804_v25 = vld [vmem:[%s2291_s5 + $0x30] sm:$0xff]  ;;  %v805_v26 = vld [vmem:[%s2291_s5 + $0x38] sm:$0xff]  ;;  %p1675_p12 = scmp.ne.s32.totalorder %s1131_s11, %s1674_s23  ;;  %s1678_s21 = sshll.u32 %s1804_s26, 4  ;;  %s1679_s21 = int_to_ptr.vmem [resolvable:$false] %s1678_s21 }
  0x8a   : > { %1463 = vmatpush3.bf16.msra.mxu0 %v1462_v12  ;;  %v1477_v24 = vpack.c.bf16 %v803_v23, %v802_v22  ;;  %v1480_v27 = vpack.c.bf16 %v805_v26, %v804_v25  ;;  %v900_v28 = vld [vmem:[%s2293_s7] sm:$0xff]  ;;  %v901_v29 = vld [vmem:[%s2293_s7 + $0x8] sm:$0xff]  ;;  %v902_v30 = vld [vmem:[%s2293_s7 + $0x10] sm:$0xff]  ;;  %s1680_s19 = scalar_lea.vmem %s1679_s21, 256  ;;  %p1681_p1 = scmp.lt.s32.totalorder %s1131_s11, %s1679_s21 }
  0x8b   : > { %1469 = vmatpush3.bf16.msra.mxu1 %v1468_v13  ;;  %1470 = vmatprep.subr.bf16.mxu0 %v1801_v0  ;;  %v1483_v31 = vpack.c.bf16 %v901_v29, %v900_v28  ;;  %v903_v32 = vld [vmem:[%s2293_s7 + $0x18] sm:$0xff]  ;;  %v981_v34 = vld [vmem:[%s2295_s9] sm:$0xff]  ;;  %v982_v35 = vld [vmem:[%s2295_s9 + $0x8] sm:$0xff]  ;;  %s1362_s17 = sshll.u32 %s2343_s15, 7  ;;  %p1682_p2 = scmp.lt.s32.totalorder %s1680_s19, %s1674_s23 }
  0x8c   : > { %1482 = vmatprep.subr.bf16.mxu1 %v1801_v0  ;;  %v1486_v33 = vpack.c.bf16 %v903_v32, %v902_v30  ;;  %v1489_v36 = vpack.c.bf16 %v982_v35, %v981_v34  ;;  %v983_v37 = vld [vmem:[%s2295_s9 + $0x10] sm:$0xff]  ;;  %v984_v38 = vld [vmem:[%s2295_s9 + $0x18] sm:$0xff]  ;;  %v1350_v42 = vld [vmem:[%s2290_s4] ss:$0 sm:$0xff]  ;;  %p2346_p0 = scmp.ne.s32.totalorder %s2344_s16, 0 }
  0x8d   : > { %1404 = vmatmul.mubr.msk.f32.vlgmr.msra.gmra.mrb[0].mxu0 %vm631_vm0, %v626_v16  ;;  %v1492_v39 = vpack.c.bf16 %v984_v38, %v983_v37  ;;  %v797_v52 = vld [vmem:[#allocation2] sm:$0xff]  ;;  %v1354_v63 = vld [vmem:[#allocation8] ss:$0 sm:$0xff]  ;;  %s2204_s12 = scalar_lea.hbm %s2345_s25, %s1362_s17  ;;  %p1683_p7 = por %p1682_p2, %p1681_p1 }
  0x8e   : > { %1415 = vmatmul.mubr.msk.f32.vlgmr.msra.gmra.mrb[0].mxu1 %vm631_vm0, %v625_v18  ;;  %1472 = vmatpush3.bf16.msra.mxu0 %v1471_v17  ;;  %v1352_v56 = vld [vmem:[%s2292_s6] ss:$0 sm:$0xff]  ;;  %p1676_p5 = pnand %p1675_p12, %p2346_p0 }
  0x8f   : > { %1473 = vmatprep.subr.bf16.mxu0 %v1801_v0  ;;  %1433 = vmatprep.mubr.msk.f32.mxu0 %vm1803_vm1, %v1802_v1  ;;  %v1356_v62 = vld [vmem:[%s2296_s10] ss:$0 sm:$0xff] }
  0x90   : > { %1444 = vmatprep.mubr.msk.f32.mxu1 %vm1803_vm1, %v1802_v1  ;;  %1484 = vmatpush3.bf16.msra.mxu1 %v1483_v31  ;;  %p1677_p10 = pneg %p1676_p5 }
  0x91   : > { %1485 = vmatprep.subr.bf16.mxu1 %v1801_v0 }
  0x92   : > { %1475 = vmatpush3.bf16.msra.mxu0 %v1474_v21  ;;  %p1684_p4 = pnand %p1683_p7, %p1677_p10 }
  0x93   : > { %1476 = vmatprep.subr.bf16.mxu0 %v1801_v0 }
  0x94   : > { %1487 = vmatpush3.bf16.msra.mxu1 %v1486_v33 }
  0x95   : > { %1488 = vmatprep.subr.bf16.mxu1 %v1801_v0 }
  0x96   : > { %1478 = vmatpush3.bf16.msra.mxu0 %v1477_v24 }
  0x97   : > { %1479 = vmatprep.subr.bf16.mxu0 %v1801_v0  ;;  %1445 = vmatmul.mubr.msk.f32.vlgmr.msra.gmra.mrb[2].mxu1 %vm631_vm0, %v625_v18 }
  0x98   : > { %1490 = vmatpush3.bf16.msra.mxu1 %v1489_v36  ;;  %1455 = vmatprep.mubr.msk.f32.mxu1 %vm1803_vm1, %v1802_v1 }
  0x99   : > { %1491 = vmatprep.subr.bf16.mxu1 %v1801_v0 }
  0x9a   : > { %1481 = vmatpush3.bf16.msra.mxu0 %v1480_v27 }
  0x9c   : > { %1493 = vmatpush3.bf16.msra.mxu1 %v1492_v39 }
  0x9f   : > { %1456 = vmatmul.mubr.msk.f32.vlgmr.msra.gmra.mrb[4].mxu1 %vm631_vm0, %v626_v16 }
 0x160   : > { %v711_v40 = vpop.f32.mrb[0].mxu0 }
 0x161   : > { %v784_v41 = vpop.f32.mrb[0].mxu1  ;;  %v1405_v43 = vpop.f32.mrb[1].mxu0 }
 0x162   : > { %v785_v44 = vadd.f32 %v784_v41, %v711_v40  ;;  %v1416_v45 = vpop.f32.mrb[1].mxu1 }
 0x164   : > { %v795_v46 = vadd.f32 %v1350_v42, %v785_v44 }
 0x166   : > { %v796_v47 = vmax.f32 %v795_v46, 0.0 }
 0x168   : > { %1434 = vmatmul.mubr.msk.f32.vlgmr.msra.gmra.mrb[2].mxu0 %vm806_vm2, %v796_v47 }
 0x16a   : > { %v977_v48 = vpop.f32.mrb[2].mxu1 }
 0x16b   : > { %v1446_v49 = vpop.f32.mrb[3].mxu1  ;;  %v978_v2 = vadd.f32 %v1354_v63, %v977_v48 }
 0x172   : > { %v1058_v50 = vpop.f32.mrb[4].mxu1 }
 0x173   : > { %v1457_v51 = vpop.f32.mrb[5].mxu1  ;;  %v1059_v0 = vadd.f32 %v1356_v62, %v1058_v50 }
 0x23b   : > { %v876_v53 = vpop.f32.mrb[2].mxu0 }
 0x23c   : > { %v880_v54 = vadd.f32 %v876_v53, %v797_v52  ;;  %v1435_v55 = vpop.f32.mrb[3].mxu0 }
 0x23e   : > { %881 = vst.msk [vmem:[#allocation2] sm:$0xff] %vm631_vm0, %v880_v54 }
 0x245   : > { %v885_v57 = vld [vmem:[#allocation2] sm:$0xff] }
 0x246   : > { %v893_v58 = vadd.f32 %v1352_v56, %v885_v57 }
 0x248   : > { %v1353_v59 = vmul.f32 -1.442695, %v893_v58 }
 0x24a   : > { %1580 = vpow2.f32 %v1353_v59 }
 0x254   : > { %v1581_v60 = vpop.eup %1580 }
 0x255   : > { %v897_v61 = vadd.f32 1.0, %v1581_v60 }
 0x257   : > { %1582 = vrcp.f32 %v897_v61 }
 0x261   : > { %v1583_v1 = vpop.eup %1582 }
 0x262   : > { %v1063_v3 = vsub.f32 1.0, %v1583_v1  ;;  %1097 = vst.msk [vmem:[%s607_s22] sm:$0xff] %vm631_vm0, %v1583_v1  ;;  %v1062_v4 = vmul.f32 %v1583_v1, %v978_v2 }
 0x264   : > { %v1064_v5 = vmul.f32 %v1063_v3, %v1059_v0 }
 0x266   : > { %v1065_v6 = vadd.f32 %v1064_v5, %v1062_v4 }
 0x268   : > { %v1066_v7 = vsel %vm631_vm0, %v1065_v6, 0.0 }
 0x269   : > { %1067 = vadd.xlane.f32.xlu0 %v1066_v7 }
 0x2f6   : > { %v1068_v8 = vpop.xlane.xlu0 %1067 }
 0x2f7   : > { %v1070_v9 = vmul.f32 0.03125, %v1068_v8 }
 0x2f9   : > { %v1071_v10 = vsub.f32 %v1065_v6, %v1070_v9 }
 0x2fb   : > { %v1072_v11 = vmul.f32 %v1071_v10, %v1071_v10 }
 0x2fd   : > { %v1073_v12 = vsel %vm631_vm0, %v1072_v11, 0.0 }
 0x2fe   : > { %1074 = vadd.xlane.f32.xlu0 %v1073_v12 }
 0x2ff   : > { %1687 = shalt.err (!%p1684_p4)
}
 0x300   : > { %s1688_s28 = scalar_lea.hbm %s2204_s12, 128  ;;  %s1692_s22 = scalar_lea.hbm %s2345_s25, 256 }
 0x301   : > { %p1689_p8 = scmp.ne.s32.totalorder %s2204_s12, %s1688_s28  ;;  %p1693_p13 = scmp.lt.u32.totalorder %s2204_s12, %s2345_s25 }
 0x302   : > { %p1694_p11 = scmp.lt.u32.totalorder %s1692_s22, %s1688_s28  ;;  %p1696_p12 = scmp.lt.u32.totalorder %s1688_s28, %s2204_s12 }
 0x303   : > { %p1690_p9 = pnand %p1689_p8, %p2346_p0 }
 0x304   : > { %p1695_p3 = por %p1694_p11, %p1693_p13 }
 0x305   : > { %p1691_p6 = pneg %p1690_p9 }
 0x306   : > { %p1697_p5 = por %p1696_p12, %p1695_p3 }
 0x308   : > { %p1698_p10 = pnand %p1697_p5, %p1691_p6 }
 0x30a   : > { %1701 = shalt.err (!%p1698_p10)
}
 0x30b   : > { %1503 = dma.vmem_to_hbm [thread:$0]  (%p2346_p0), %s1131_s11, 128, %s2204_s12, %s1104_s13  }
 0x30c   : > { %s2347_s21 = sld [smem:[#allocation26_spill]]  ;;  %s2348_s20 = sld [smem:[#allocation27_spill]] }
 0x30d   : > { %s600_s27 = scalar_lea.vmem [#allocation9], %s2062_s14  ;;  %s2349_s13 = sld [smem:[#allocation28_spill]] }
 0x30e   : > { %s1117_s22 = sshll.u32 %s600_s27, 4  ;;  %s1099_s24 = scalar_lea.sflag [#allocation5], %s2059_s29  ;;  %s2238_s22 = int_to_ptr.vmem [resolvable:$true] %s1117_s22 }
 0x30f   : > { %s1702_s23 = scalar_lea.vmem %s2238_s22, 128  ;;  %s1805_s14 = smov [#allocation9]  }
 0x310   : > { %p1703_p1 = scmp.ne.s32.totalorder %s2238_s22, %s1702_s23  ;;  %s1706_s15 = sshll.u32 %s1805_s14, 4  ;;  %s1707_s15 = int_to_ptr.vmem [resolvable:$false] %s1706_s15 }
 0x311   : > { %s1708_s26 = scalar_lea.vmem %s1707_s15, 256  ;;  %p1709_p4 = scmp.lt.s32.totalorder %s2238_s22, %s1707_s15 }
 0x312   : > { %v1358_v17 = vld [vmem:[%s2347_s21] ss:$0 sm:$0xff]  ;;  %p1704_p2 = pnand %p1703_p1, %p2346_p0  ;;  %p1710_p8 = scmp.lt.s32.totalorder %s1708_s26, %s1702_s23 }
 0x313   : > { %v1359_v19 = vld [vmem:[%s2348_s20] ss:$0 sm:$0xff]  ;;  %s2236_s8 = scalar_lea.hbm %s2349_s13, %s1362_s17 }
 0x314   : > { %p1705_p7 = pneg %p1704_p2  ;;  %p1711_p9 = por %p1710_p8, %p1709_p4 }
 0x316   : > { %p1712_p6 = pnand %p1711_p9, %p1705_p7 }
 0x38b   : > { %v1075_v13 = vpop.xlane.xlu0 %1074 }
 0x38c   : > { %v1076_v14 = vmul.f32 0.03125, %v1075_v13 }
 0x38e   : > { %v1077_v15 = vadd.f32 1e-05, %v1076_v14 }
 0x390   : > { %1584 = vrsqrt.f32 %v1077_v15 }
 0x39a   : > { %v1585_v16 = vpop.eup %1584 }
 0x39b   : > { %v1079_v18 = vmul.f32 %v1585_v16, %v1071_v10 }
 0x39d   : > { %v1087_v20 = vmul.f32 %v1358_v17, %v1079_v18 }
 0x39f   : > { %v1095_v21 = vadd.f32 %v1359_v19, %v1087_v20 }
 0x3a1   : > { %1096 = vst.msk [vmem:[%s600_s27] sm:$0xff] %vm631_vm0, %v1095_v21 }
 0x3a2   : > { %1715 = shalt.err (!%p1712_p6)
}
 0x3a3   : > { %s1716_s29 = scalar_lea.hbm %s2236_s8, 128  ;;  %s1720_s19 = scalar_lea.hbm %s2349_s13, 256 }
 0x3a4   : > { %p1717_p13 = scmp.ne.s32.totalorder %s2236_s8, %s1716_s29  ;;  %p1721_p12 = scmp.lt.u32.totalorder %s2236_s8, %s2349_s13 }
 0x3a5   : > { %p1722_p5 = scmp.lt.u32.totalorder %s1720_s19, %s1716_s29  ;;  %p1724_p1 = scmp.lt.u32.totalorder %s1716_s29, %s2236_s8 }
 0x3a6   : > { %p1718_p11 = pnand %p1717_p13, %p2346_p0 }
 0x3a7   : > { %p1723_p10 = por %p1722_p5, %p1721_p12 }
 0x3a8   : > { %p1719_p3 = pneg %p1718_p11 }
 0x3a9   : > { %p1725_p2 = por %p1724_p1, %p1723_p10 }
 0x3ab   : > { %p1726_p7 = pnand %p1725_p2, %p1719_p3 }
 0x3ad   : > { %1729 = shalt.err (!%p1726_p7)
}
 0x3ae   : > { %1502 = dma.vmem_to_hbm [thread:$0]  (%p2346_p0), %s2238_s22, 128, %s2236_s8, %s1099_s24  }
 0x3af PF: > { %s2350_s27 = sld [smem:[#allocation17_spill]]  ;;  %s2351_s12 = sld [smem:[#allocation21_spill]] }
 0x3b0   : > { %p2353_p8 = scmp.ge.s32.totalorder %s1796_s18, 2 }
 0x3b5   : > { %s1142_s11 = sand.u32 1, %s2350_s27   ;;  %p2352_p4 = scmp.ne.s32.totalorder %s2351_s12, 0 }
 0x3b6   : > { %s1143_s23 = scalar_lea.sflag [#allocation5], %s1142_s11 }
 0x3b7   : > { %p1518_p9 = pnand %p2353_p8, %p2352_p4 }
 0x3b9   : > { %1767 = dma.done.wait (!%p1518_p9), %s1143_s23, 128  }
 0x3ba   : > { %1769 = vsyncadd (!%p1518_p9), %s1143_s23, 4294967168  ;;  %s1152_s14 = scalar_lea.sflag [#allocation11], %s1142_s11 }
 0x3bb   : > { %1771 = dma.done.wait (!%p1518_p9), %s1152_s14, 128  }
 0x3bc   : > { %1773 = vsyncadd (!%p1518_p9), %s1152_s14, 4294967168  ;;  %s37_s18 = sadd.s32 1, %s1796_s18   ;;  %s2354_s16 = sld [smem:[#allocation18_spill]] }
 0x3bd   : > { %p34_p6 = scmp.ge.s32.totalorder %s37_s18, 4   ;;  %s2355_s15 = sld [smem:[#allocation24_spill]] }
 0x3be   : > { %s2356_s22 = sld [smem:[#allocation20_spill]]  ;;  %s2357_s17 = sld [smem:[#allocation22_spill]] }
 0x3bf   : > { %s2358_s29 = smov %s1780_s30  ;;  %36 = sbr.rel (!%p34_p6) target bundleno = 16 (0x10), region = 171 }
 0x3c2   : > { %s2359_s30 = smov %s2354_s16 }
 0x3c4   : > { %s2360_s16 = smov %s2356_s22 }
 0x3c6   :  { %1157 = vsyncpa [#allocation4], 1 }
 0x3c7   :  { %1159 = vsyncpa [#allocation4 + $0x1], 1 }
 0x3c8   :  { %1160 = vsyncpa [#allocation7], 1 }
 0x3c9   :  { %1162 = vsyncpa [#allocation7 + $0x1], 1 }
 0x3ca   :  { %1163 = vsyncpa [#allocation5], 1 }
 0x3cb   :  { %1165 = vsyncpa [#allocation5 + $0x1], 1 }
 0x3cc   :  { %1166 = vsyncpa [#allocation11], 1 }
 0x3cd   :  { %1168 = vsyncpa [#allocation11 + $0x1], 1 }

// kernel: tpu_custom_call.1
= control target key start
LH: loop header
LB: loop body
LE: loop exit
PB: predicated region body
PF: predicated region fallthrough
CT: control target
= control target key end

     0   :  { %s2286_s0 = inlined_call_operand.hbm [shape: f32[16,32], index: 0, kind: input, shape index: {}]   ;;  %s2287_s1 = inlined_call_operand.hbm [shape: f32[16,32], index: 1, kind: input, shape index: {}]   ;;  %s2288_s2 = inlined_call_operand.vmem [shape: f32[32,64], index: 2, kind: input, shape index: {}]   ;;  %s2289_s3 = inlined_call_operand.vmem [shape: f32[32,64], index: 3, kind: input, shape index: {}]   ;;  %s2290_s4 = inlined_call_operand.vmem [shape: f32[1,64], index: 4, kind: input, shape index: {}]   ;;  %s2291_s5 = inlined_call_operand.vmem [shape: f32[64,32], index: 5, kind: input, shape index: {}]   ;;  %s2292_s6 = inlined_call_operand.vmem [shape: f32[1,32], index: 6, kind: input, shape index: {}]   ;;  %s2293_s7 = inlined_call_operand.vmem [shape: f32[32,32], index: 7, kind: input, shape index: {}]   ;;  %s2294_s8 = inlined_call_operand.hbm [shape: f32[1,32], index: 8, kind: input, shape index: {}]   ;;  %s2295_s9 = inlined_call_operand.vmem [shape: f32[32,32], index: 9, kind: input, shape index: {}]   ;;  %s2296_s10 = inlined_call_operand.vmem [shape: f32[1,32], index: 10, kind: input, shape index: {}]   ;;  %s2297_s11 = inlined_call_operand.vmem [shape: f32[1,32], index: 11, kind: input, shape index: {}]   ;;  %s2298_s12 = inlined_call_operand.vmem [shape: f32[1,32], index: 12, kind: input, shape index: {}]   ;;  %s2299_s13 = inlined_call_operand.hbm [shape: f32[16,32], index: 13, kind: output, shape index: {0}]   ;;  %s2300_s14 = inlined_call_operand.hbm [shape: f32[16,32], index: 14, kind: output, shape index: {1}]  }
   0x1   :  { %2315 = sst [smem:[#allocation25_spill]] %s2294_s8 }
   0x2   :  { %2316 = sst [smem:[#allocation26_spill]] %s2297_s11 }
   0x3   :  { %2317 = sst [smem:[#allocation27_spill]] %s2298_s12 }
   0x4   :  { %2318 = sst [smem:[#allocation28_spill]] %s2299_s13 }
   0x5   :  { %2319 = sst [smem:[#allocation29_spill]] %s2300_s14 }
   0x6   :  { %20 = vsyncpa [#allocation4], 0 }
   0x7   :  { %22 = vsyncpa [#allocation4 + $0x1], 0 }
   0x8   :  { %23 = vsyncpa [#allocation7], 0 }
   0x9   :  { %25 = vsyncpa [#allocation7 + $0x1], 0 }
   0xa   :  { %26 = vsyncpa [#allocation5], 0 }
   0xb   :  { %28 = vsyncpa [#allocation5 + $0x1], 0 }
   0xc   :  { %29 = vsyncpa [#allocation11], 0 }
   0xd   :  { %31 = vsyncpa [#allocation11 + $0x1], 0  ;;  %s1881_s29 = smov 0   ;;  %s1883_s30 = smov 0  }
   0xe   :  { %s1885_s15 = smov 0   ;;  %s1887_s16 = smov 0  }
   0xf   :  { %s1889_s17 = smov 0   ;;  %s1891_s18 = smov 0  }
  0x10 LB: > { %2320 = sst [smem:[#allocation17_spill]] %s1776_s29  ;;  %s1912_s19 = sadd.s32 4294967295, %s1796_s18   ;;  %s1796_s18 = sphi %s1891_s18, %s37_s18   ;;  %s1792_s17 = sphi %s1889_s17, %s2357_s17   ;;  %s1788_s16 = sphi %s1887_s16, %s2360_s16   ;;  %s1784_s15 = sphi %s1885_s15, %s2355_s15   ;;  %s1780_s30 = sphi %s1883_s30, %s2359_s30   ;;  %s1776_s29 = sphi %s1881_s29, %s2358_s29  }
  0x11   : > { %2321 = sst [smem:[#allocation18_spill]] %s1784_s15  ;;  %s1330_s20 = sadd.s32 4294967294, %s1796_s18  }
  0x12   : > { %2322 = sst [smem:[#allocation19_spill]] %s1788_s16  ;;  %p69_p0 = scmp.ne.s32.totalorder %s1780_s30, %s1776_s29 }
  0x13   : > { %2323 = sst [smem:[#allocation20_spill]] %s1792_s17  ;;  %p2305_p1 = scmp.eq.s32.totalorder %s1912_s19, 0 }
  0x14   : > { %p376_p3 = scmp.eq.s32.totalorder %s1330_s20, 1  ;;  %p1331_p5 = scmp.ge.s32.totalorder %s1796_s18, 1 }
  0x15   : > { %p1921_p4 = por %p2305_p1, %p69_p0  ;;  %p409_p7 = scmp.lt.s32.totalorder %s1796_s18, 3 }
  0x16   : > { %p1926_p6 = por %p376_p3, %p69_p0  ;;  %s1798_s24 = smov [#allocation8]  }
  0x17   : > { %s2324_s21 = scalar_select %p1921_p4, 1, 0 }
  0x18   : > { %s2325_s22 = scalar_select %p1926_p6, 1, 0 }
  0x19   : > { %p1931_p8 = pnand %p1331_p5, %p409_p7  ;;  %s457_s25 = sshll.u32 %s1798_s24, 4  ;;  %s458_s25 = int_to_ptr.vmem [resolvable:$true] %s457_s25 }
  0x1a   : > { %2326 = sst [smem:[#allocation21_spill]] %s2325_s22  ;;  %s49_s27 = sadd.s32 1, %s1792_s17 }
  0x1b   : > { %s2327_s23 = scalar_select %p1931_p8, 1, 0 }
  0x1c   : > { %p1506_p10 = pneg %p1931_p8  ;;  %p1946_p12 = scmp.ge.s32.totalorder %s49_s27, 2 }
  0x1d   : > { %s2330_s8 = sld [smem:[#allocation25_spill]] }
  0x1e   : > { %p1940_p11 = pnand %p1506_p10, %p2305_p1 }
  0x1f   : > { %s2329_s20 = scalar_select %p1946_p12, 1, 0 }
  0x20   : > { %p1588_p0 = pneg %p1940_p11 }
  0x23   : > { %s1586_s24 = scalar_lea.hbm %s2330_s8, 16 }
  0x24   : > { %p1587_p13 = scmp.ne.s32.totalorder %s2330_s8, %s1586_s24  ;;  %p1593_p7 = scmp.lt.u32.totalorder %s1586_s24, %s2330_s8 }
  0x26   : > { %p1589_p3 = pnand %p1588_p0, %p1587_p13 }
  0x28   : > { %p1590_p5 = pneg %p1589_p3 }
  0x2a   : > { %p1595_p10 = pnand %p1593_p7, %p1590_p5 }
  0x2c   : > { %1598 = shalt.err (!%p1595_p10)
}
  0x2d   : > { %s1599_s28 = scalar_lea.vmem %s458_s25, 16  ;;  %s1606_s29 = scalar_lea.vmem %s458_s25, 32 }
  0x2e   : > { %p1600_p9 = scmp.ne.s32.totalorder %s458_s25, %s1599_s28  ;;  %p1607_p6 = scmp.lt.s32.totalorder %s458_s25, %s458_s25 }
  0x2f   : > { %p1608_p4 = scmp.lt.s32.totalorder %s1606_s29, %s1599_s28 }
  0x30   : > { %p1602_p1 = pnand %p1600_p9, %p1588_p0 }
  0x31   : > { %p1609_p8 = por %p1608_p4, %p1607_p6 }
  0x32   : > { %p1603_p2 = pneg %p1602_p1 }
  0x34   : > { %p1610_p12 = pnand %p1609_p8, %p1603_p2 }
  0x36   : > { %1613 = shalt.err (!%p1610_p12)
}
  0x37   : > { %1509 = dma.hbm_to_vmem [thread:$0]  (!%p1940_p11), %s2330_s8, 16, %s458_s25, [#allocation7]  }
  0x38   : > { %p2331_p1 = scmp.ne.s32.totalorder %s2329_s20, 0  ;;  %p63_p2 = scmp.ne.s32.totalorder %s1784_s15, %s1780_s30 }
  0x39   : > { %p64_p4 = scmp.eq.s32.totalorder %s1796_s18, 0  ;;  %p1525_p6 = scmp.lt.s32.totalorder %s1796_s18, 2 }
  0x3a   : > { %s2362_s27 = smov (%p2331_p1, %s49_s27), 0  ;;  %p2333_p12 = scmp.eq.s32.totalorder %s1912_s19, 1 }
  0x3b   : > { %2332 = sst [smem:[#allocation22_spill]] %s2362_s27  ;;  %s53_s11 = ssub.s32 %s1792_s17, %s2362_s27 }
  0x3c   : > { %p54_p8 = scmp.eq.s32.totalorder %s53_s11, 0  ;;  %p65_p9 = por %p64_p4, %p63_p2 }
  0x3d   : > { %p1978_p13 = por %p2333_p12, %p63_p2  ;;  %s480_s22 = sand.u32 1, %s1784_s15  }
  0x3e   : > { %s2336_s26 = sadd.s32 1, %s1784_s15  ;;  %s1988_s25 = sshll.u32 %s480_s22, 3 }
  0x3f   : > { %s2334_s14 = scalar_select %p1978_p13, 1, 0 }
  0x40   : > { %s1986_s28 = scalar_select %p54_p8, %s1784_s15, %s2336_s26  }
  0x41   : > { %2335 = sst [smem:[#allocation23_spill]] %s2334_s14  ;;  %s1339_s20 = sshll.u32 %s1792_s17, 7 }
  0x42   : > { %2337 = sst [smem:[#allocation24_spill]] %s1986_s28  ;;  %s1994_s12 = scalar_lea.hbm %s2286_s0, %s1339_s20 }
  0x43   : > { %s484_s13 = scalar_lea.vmem [#allocation3], %s1988_s25  ;;  %p1999_p11 = pnand %p1525_p6, %p65_p9 }
  0x44   : > { %s491_s11 = sshll.u32 %s484_s13, 4  ;;  %s2006_s24 = scalar_lea.hbm %s2287_s1, %s1339_s20  ;;  %s1997_s11 = int_to_ptr.vmem [resolvable:$true] %s491_s11 }
  0x45   : > { %s498_s29 = sand.u32 1, %s1796_s18   ;;  %s481_s17 = scalar_lea.sflag [#allocation4], %s480_s22 }
  0x46   : > { %s1614_s28 = scalar_lea.hbm %s1994_s12, 128  ;;  %p1616_p3 = pneg %p1999_p11 }
  0x47   : > { %p1615_p0 = scmp.ne.s32.totalorder %s1994_s12, %s1614_s28  ;;  %s1619_s14 = scalar_lea.hbm %s2286_s0, 256 }
  0x48   : > { %p1620_p10 = scmp.lt.u32.totalorder %s1994_s12, %s2286_s0  ;;  %p1621_p1 = scmp.lt.u32.totalorder %s1619_s14, %s1614_s28 }
  0x49   : > { %p1617_p5 = pnand %p1616_p3, %p1615_p0  ;;  %p1623_p4 = scmp.lt.u32.totalorder %s1614_s28, %s1994_s12 }
  0x4a   : > { %p1622_p2 = por %p1621_p1, %p1620_p10 }
  0x4b   : > { %p1618_p7 = pneg %p1617_p5 }
  0x4c   : > { %p1624_p6 = por %p1623_p4, %p1622_p2 }
  0x4e   : > { %p1625_p8 = pnand %p1624_p6, %p1618_p7 }
  0x50   : > { %1628 = shalt.err (!%p1625_p8)
}
  0x51   : > { %s1629_s27 = scalar_lea.vmem %s1997_s11, 128  ;;  %s1799_s15 = smov [#allocation3]  }
  0x52   : > { %p1630_p9 = scmp.ne.s32.totalorder %s1997_s11, %s1629_s27  ;;  %s1634_s22 = sshll.u32 %s1799_s15, 4  ;;  %s1635_s22 = int_to_ptr.vmem [resolvable:$false] %s1634_s22 }
  0x53   : > { %s1636_s16 = scalar_lea.vmem %s1635_s22, 256  ;;  %p1637_p5 = scmp.lt.s32.totalorder %s1997_s11, %s1635_s22 }
  0x54   : > { %p1632_p12 = pnand %p1630_p9, %p1616_p3  ;;  %p1638_p10 = scmp.lt.s32.totalorder %s1636_s16, %s1629_s27 }
  0x56   : > { %p1633_p0 = pneg %p1632_p12  ;;  %p1639_p1 = por %p1638_p10, %p1637_p5 }
  0x58   : > { %p1640_p2 = pnand %p1639_p1, %p1633_p0 }
  0x5a   : > { %1643 = shalt.err (!%p1640_p2)
}
  0x5b   : > { %1513 = dma.hbm_to_vmem [thread:$0]  (!%p1999_p11), %s1994_s12, 128, %s1997_s11, %s481_s17  }
  0x5c   : > { %s502_s14 = scalar_lea.vmem [#allocation6], %s1988_s25  ;;  %s499_s20 = scalar_lea.sflag [#allocation7], %s498_s29 }
  0x5d   : > { %s509_s28 = sshll.u32 %s502_s14, 4  ;;  %s1644_s13 = scalar_lea.hbm %s2006_s24, 128  ;;  %s510_s28 = int_to_ptr.vmem [resolvable:$true] %s509_s28 }
  0x5e   : > { %p1645_p7 = scmp.ne.s32.totalorder %s2006_s24, %s1644_s13  ;;  %s1649_s15 = scalar_lea.hbm %s2287_s1, 256 }
  0x5f   : > { %p1650_p8 = scmp.lt.u32.totalorder %s2006_s24, %s2287_s1  ;;  %p1651_p9 = scmp.lt.u32.totalorder %s1649_s15, %s1644_s13 }
  0x60   : > { %p1647_p4 = pnand %p1645_p7, %p1616_p3  ;;  %p1653_p0 = scmp.lt.u32.totalorder %s1644_s13, %s2006_s24 }
  0x61   : > { %p1652_p12 = por %p1651_p9, %p1650_p8 }
  0x62   : > { %p1648_p6 = pneg %p1647_p4 }
  0x63   : > { %p1654_p5 = por %p1653_p0, %p1652_p12 }
  0x65   : > { %p1655_p10 = pnand %p1654_p5, %p1648_p6 }
  0x67   : > { %1658 = shalt.err (!%p1655_p10)
}
  0x68   : > { %s1659_s17 = scalar_lea.vmem %s510_s28, 128  ;;  %s1800_s25 = smov [#allocation6]  }
  0x69   : > { %p1660_p1 = scmp.ne.s32.totalorder %s510_s28, %s1659_s17  ;;  %s1664_s12 = sshll.u32 %s1800_s25, 4  ;;  %s1665_s12 = int_to_ptr.vmem [resolvable:$false] %s1664_s12 }
  0x6a   : > { %s1666_s11 = scalar_lea.vmem %s1665_s12, 256  ;;  %p1667_p4 = scmp.lt.s32.totalorder %s510_s28, %s1665_s12 }
  0x6b   : > { %p1662_p2 = pnand %p1660_p1, %p1616_p3  ;;  %p1668_p13 = scmp.lt.s32.totalorder %s1666_s11, %s1659_s17 }
  0x6d   : > { %p1663_p7 = pneg %p1662_p2  ;;  %p1669_p8 = por %p1668_p13, %p1667_p4 }
  0x6f   : > { %p1670_p9 = pnand %p1669_p8, %p1663_p7 }
  0x71   : > { %1673 = shalt.err (!%p1670_p9)
}
  0x72   : > { %1516 = dma.hbm_to_vmem [thread:$0]  (!%p1999_p11), %s2006_s24, 128, %s510_s28, %s499_s20  }
  0x73   : > { %p2339_p6 = scmp.ne.s32.totalorder %s2327_s23, 0 }
  0x74   : > { %s2059_s29 = sand.u32 (!%p2339_p6), 1, %s1780_s30   ;;  %p2340_p13 = scmp.ne.s32.totalorder (!%p2339_p6), %s2324_s21, 0 }
  0x75   : > { %518 = sbr.rel (%p2339_p6) target bundleno = 943 (0x3af), region = 72  ;;  %s2062_s14 = sshll.u32 (!%p2339_p6), %s2059_s29, 3 }
  0x76   : > { %s521_s13 = scalar_lea.sflag (!%p2339_p6), [#allocation4], %s2059_s29  ;;  %s524_s8 = scalar_lea.vmem (!%p2339_p6), [#allocation3], %s2062_s14 }
  0x7c   : > { %1755 = dma.done.wait (%p2340_p13), %s521_s13, 128  }
  0x7d   : > { %1757 = vsyncadd (%p2340_p13), %s521_s13, 4294967168  ;;  %s529_s23 = sand.u32 1, %s1912_s19   ;;  %s533_s24 = scalar_lea.vmem [#allocation6], %s2062_s14 }
  0x7e   : > { %s530_s26 = scalar_lea.sflag [#allocation7], %s529_s23 }
  0x7f   : > { %1759 = dma.done.wait (%p2340_p13), %s530_s26, 128  }
  0x80   : > { %1761 = vsyncadd (%p2340_p13), %s530_s26, 4294967168  ;;  %p2341_p11 = scmp.eq.s32.totalorder %s1912_s19, 0 }
  0x82   : > { %1763 = dma.done.wait (%p2341_p11), [#allocation7], 16   ;;  %p2342_p3 = pmov %p2341_p11 }
  0x83   : > { %vm631_vm0 = vcmask 261120   ;;  %v1801_v0 = vmov 0.0|0.0   ;;  %v1802_v1 = vmov 0.0   ;;  %vm1803_vm1 = vmmov 0   ;;  %v637_v2 = vld [vmem:[%s2289_s3] sm:$0xff]  ;;  %v638_v3 = vld [vmem:[%s2289_s3 + $0x8] sm:$0xff] }
  0x84   : > { %1765 = vsyncadd (%p2342_p3), [#allocation7], 4294967280  ;;  %1458 = vmatprep.subr.bf16.mxu0 %v1801_v0  ;;  %1464 = vmatprep.subr.bf16.mxu1 %v1801_v0  ;;  %632 = vst.msk [vmem:[#allocation2] sm:$0xff] %vm631_vm0, %v1802_v1  ;;  %v633_v4 = vld [vmem:[%s2288_s2] sm:$0xff]  ;;  %v1459_v5 = vpack.c.bf16 %v638_v3, %v637_v2  ;;  %v634_v6 = vld [vmem:[%s2288_s2 + $0x8] sm:$0xff]  ;;  %vm806_vm2 = vcmask 523264  }
  0x85   : > { %1403 = vmatprep.mubr.msk.f32.mxu0 %vm1803_vm1, %v1802_v1  ;;  %1414 = vmatprep.mubr.msk.f32.mxu1 %vm1803_vm1, %v1802_v1  ;;  %v639_v7 = vld [vmem:[%s2289_s3 + $0x10] sm:$0xff]  ;;  %v640_v8 = vld [vmem:[%s2289_s3 + $0x18] sm:$0xff]  ;;  %v1465_v9 = vpack.c.bf16 %v634_v6, %v633_v4  ;;  %v798_v14 = vld [vmem:[%s2291_s5] sm:$0xff]  ;;  %s2343_s15 = sld [smem:[#allocation19_spill]]  ;;  %s607_s22 = scalar_lea.vmem [#allocation10], %s2062_s14 }
  0x86   : > { %v635_v10 = vld [vmem:[%s2288_s2 + $0x10] sm:$0xff]  ;;  %v636_v11 = vld [vmem:[%s2288_s2 + $0x18] sm:$0xff]  ;;  %1460 = vmatpush3.bf16.msra.mxu0 %v1459_v5  ;;  %v1462_v12 = vpack.c.bf16 %v640_v8, %v639_v7  ;;  %v799_v15 = vld [vmem:[%s2291_s5 + $0x8] sm:$0xff]  ;;  %s2344_s16 = sld [smem:[#allocation23_spill]]  ;;  %s1130_s11 = sshll.u32 %s607_s22, 4  ;;  %s1131_s11 = int_to_ptr.vmem [resolvable:$true] %s1130_s11 }
  0x87   : > { %1466 = vmatpush3.bf16.msra.mxu1 %v1465_v9  ;;  %1461 = vmatprep.subr.bf16.mxu0 %v1801_v0  ;;  %v1468_v13 = vpack.c.bf16 %v636_v11, %v635_v10  ;;  %v626_v16 = vld [vmem:[%s533_s24] sm:$0xff]  ;;  %v1471_v17 = vpack.c.bf16 %v799_v15, %v798_v14  ;;  %v625_v18 = vld [vmem:[%s524_s8] sm:$0xff]  ;;  %s2345_s25 = sld [smem:[#allocation29_spill]]  ;;  %s1104_s13 = scalar_lea.sflag [#allocation11], %s2059_s29 }
  0x88   : > { %1467 = vmatprep.subr.bf16.mxu1 %v1801_v0  ;;  %v800_v19 = vld [vmem:[%s2291_s5 + $0x10] sm:$0xff]  ;;  %v801_v20 = vld [vmem:[%s2291_s5 + $0x18] sm:$0xff]  ;;  %v802_v22 = vld [vmem:[%s2291_s5 + $0x20] sm:$0xff]  ;;  %s1674_s23 = scalar_lea.vmem %s1131_s11, 128  ;;  %s1804_s26 = smov [#allocation10]  }
  0x89   : > { %v1474_v21 = vpack.c.bf16 %v801_v20, %v800_v19  ;;  %v803_v23 = vld [vmem:[%s2291_s5 + $0x28] sm:$0xff]  ;;  %v804_v25 = vld [vmem:[%s2291_s5 + $0x30] sm:$0xff]  ;;  %v805_v26 = vld [vmem:[%s2291_s5 + $0x38] sm:$0xff]  ;;  %p1675_p12 = scmp.ne.s32.totalorder %s1131_s11, %s1674_s23  ;;  %s1678_s21 = sshll.u32 %s1804_s26, 4  ;;  %s1679_s21 = int_to_ptr.vmem [resolvable:$false] %s1678_s21 }
  0x8a   : > { %1463 = vmatpush3.bf16.msra.mxu0 %v1462_v12  ;;  %v1477_v24 = vpack.c.bf16 %v803_v23, %v802_v22  ;;  %v1480_v27 = vpack.c.bf16 %v805_v26, %v804_v25  ;;  %v900_v28 = vld [vmem:[%s2293_s7] sm:$0xff]  ;;  %v901_v29 = vld [vmem:[%s2293_s7 + $0x8] sm:$0xff]  ;;  %v902_v30 = vld [vmem:[%s2293_s7 + $0x10] sm:$0xff]  ;;  %s1680_s19 = scalar_lea.vmem %s1679_s21, 256  ;;  %p1681_p1 = scmp.lt.s32.totalorder %s1131_s11, %s1679_s21 }
  0x8b   : > { %1469 = vmatpush3.bf16.msra.mxu1 %v1468_v13  ;;  %1470 = vmatprep.subr.bf16.mxu0 %v1801_v0  ;;  %v1483_v31 = vpack.c.bf16 %v901_v29, %v900_v28  ;;  %v903_v32 = vld [vmem:[%s2293_s7 + $0x18] sm:$0xff]  ;;  %v981_v34 = vld [vmem:[%s2295_s9] sm:$0xff]  ;;  %v982_v35 = vld [vmem:[%s2295_s9 + $0x8] sm:$0xff]  ;;  %s1362_s17 = sshll.u32 %s2343_s15, 7  ;;  %p1682_p2 = scmp.lt.s32.totalorder %s1680_s19, %s1674_s23 }
  0x8c   : > { %1482 = vmatprep.subr.bf16.mxu1 %v1801_v0  ;;  %v1486_v33 = vpack.c.bf16 %v903_v32, %v902_v30  ;;  %v1489_v36 = vpack.c.bf16 %v982_v35, %v981_v34  ;;  %v983_v37 = vld [vmem:[%s2295_s9 + $0x10] sm:$0xff]  ;;  %v984_v38 = vld [vmem:[%s2295_s9 + $0x18] sm:$0xff]  ;;  %v1350_v42 = vld [vmem:[%s2290_s4] ss:$0 sm:$0xff]  ;;  %p2346_p0 = scmp.ne.s32.totalorder %s2344_s16, 0 }
  0x8d   : > { %1404 = vmatmul.mubr.msk.f32.vlgmr.msra.gmra.mrb[0].mxu0 %vm631_vm0, %v626_v16  ;;  %v1492_v39 = vpack.c.bf16 %v984_v38, %v983_v37  ;;  %v797_v52 = vld [vmem:[#allocation2] sm:$0xff]  ;;  %v1354_v63 = vld [vmem:[#allocation8] ss:$0 sm:$0xff]  ;;  %s2204_s12 = scalar_lea.hbm %s2345_s25, %s1362_s17  ;;  %p1683_p7 = por %p1682_p2, %p1681_p1 }
  0x8e   : > { %1415 = vmatmul.mubr.msk.f32.vlgmr.msra.gmra.mrb[0].mxu1 %vm631_vm0, %v625_v18  ;;  %1472 = vmatpush3.bf16.msra.mxu0 %v1471_v17  ;;  %v1352_v56 = vld [vmem:[%s2292_s6] ss:$0 sm:$0xff]  ;;  %p1676_p5 = pnand %p1675_p12, %p2346_p0 }
  0x8f   : > { %1473 = vmatprep.subr.bf16.mxu0 %v1801_v0  ;;  %1433 = vmatprep.mubr.msk.f32.mxu0 %vm1803_vm1, %v1802_v1  ;;  %v1356_v62 = vld [vmem:[%s2296_s10] ss:$0 sm:$0xff] }
  0x90   : > { %1444 = vmatprep.mubr.msk.f32.mxu1 %vm1803_vm1, %v1802_v1  ;;  %1484 = vmatpush3.bf16.msra.mxu1 %v1483_v31  ;;  %p1677_p10 = pneg %p1676_p5 }
  0x91   : > { %1485 = vmatprep.subr.bf16.mxu1 %v1801_v0 }
  0x92   : > { %1475 = vmatpush3.bf16.msra.mxu0 %v1474_v21  ;;  %p1684_p4 = pnand %p1683_p7, %p1677_p10 }
  0x93   : > { %1476 = vmatprep.subr.bf16.mxu0 %v1801_v0 }
  0x94   : > { %1487 = vmatpush3.bf16.msra.mxu1 %v1486_v33 }
  0x95   : > { %1488 = vmatprep.subr.bf16.mxu1 %v1801_v0 }
  0x96   : > { %1478 = vmatpush3.bf16.msra.mxu0 %v1477_v24 }
  0x97   : > { %1479 = vmatprep.subr.bf16.mxu0 %v1801_v0  ;;  %1445 = vmatmul.mubr.msk.f32.vlgmr.msra.gmra.mrb[2].mxu1 %vm631_vm0, %v625_v18 }
  0x98   : > { %1490 = vmatpush3.bf16.msra.mxu1 %v1489_v36  ;;  %1455 = vmatprep.mubr.msk.f32.mxu1 %vm1803_vm1, %v1802_v1 }
  0x99   : > { %1491 = vmatprep.subr.bf16.mxu1 %v1801_v0 }
  0x9a   : > { %1481 = vmatpush3.bf16.msra.mxu0 %v1480_v27 }
  0x9c   : > { %1493 = vmatpush3.bf16.msra.mxu1 %v1492_v39 }
  0x9f   : > { %1456 = vmatmul.mubr.msk.f32.vlgmr.msra.gmra.mrb[4].mxu1 %vm631_vm0, %v626_v16 }
 0x160   : > { %v711_v40 = vpop.f32.mrb[0].mxu0 }
 0x161   : > { %v784_v41 = vpop.f32.mrb[0].mxu1  ;;  %v1405_v43 = vpop.f32.mrb[1].mxu0 }
 0x162   : > { %v785_v44 = vadd.f32 %v784_v41, %v711_v40  ;;  %v1416_v45 = vpop.f32.mrb[1].mxu1 }
 0x164   : > { %v795_v46 = vadd.f32 %v1350_v42, %v785_v44 }
 0x166   : > { %v796_v47 = vmax.f32 %v795_v46, 0.0 }
 0x168   : > { %1434 = vmatmul.mubr.msk.f32.vlgmr.msra.gmra.mrb[2].mxu0 %vm806_vm2, %v796_v47 }
 0x16a   : > { %v977_v48 = vpop.f32.mrb[2].mxu1 }
 0x16b   : > { %v1446_v49 = vpop.f32.mrb[3].mxu1  ;;  %v978_v2 = vadd.f32 %v1354_v63, %v977_v48 }
 0x172   : > { %v1058_v50 = vpop.f32.mrb[4].mxu1 }
 0x173   : > { %v1457_v51 = vpop.f32.mrb[5].mxu1  ;;  %v1059_v0 = vadd.f32 %v1356_v62, %v1058_v50 }
 0x23b   : > { %v876_v53 = vpop.f32.mrb[2].mxu0 }
 0x23c   : > { %v880_v54 = vadd.f32 %v876_v53, %v797_v52  ;;  %v1435_v55 = vpop.f32.mrb[3].mxu0 }
 0x23e   : > { %881 = vst.msk [vmem:[#allocation2] sm:$0xff] %vm631_vm0, %v880_v54 }
 0x245   : > { %v885_v57 = vld [vmem:[#allocation2] sm:$0xff] }
 0x246   : > { %v893_v58 = vadd.f32 %v1352_v56, %v885_v57 }
 0x248   : > { %v1353_v59 = vmul.f32 -1.442695, %v893_v58 }
 0x24a   : > { %1580 = vpow2.f32 %v1353_v59 }
 0x254   : > { %v1581_v60 = vpop.eup %1580 }
 0x255   : > { %v897_v61 = vadd.f32 1.0, %v1581_v60 }
 0x257   : > { %1582 = vrcp.f32 %v897_v61 }
 0x261   : > { %v1583_v1 = vpop.eup %1582 }
 0x262   : > { %v1063_v3 = vsub.f32 1.0, %v1583_v1  ;;  %1097 = vst.msk [vmem:[%s607_s22] sm:$0xff] %vm631_vm0, %v1583_v1  ;;  %v1062_v4 = vmul.f32 %v1583_v1, %v978_v2 }
 0x264   : > { %v1064_v5 = vmul.f32 %v1063_v3, %v1059_v0 }
 0x266   : > { %v1065_v6 = vadd.f32 %v1064_v5, %v1062_v4 }
 0x268   : > { %v1066_v7 = vsel %vm631_vm0, %v1065_v6, 0.0 }
 0x269   : > { %1067 = vadd.xlane.f32.xlu0 %v1066_v7 }
 0x2f6   : > { %v1068_v8 = vpop.xlane.xlu0 %1067 }
 0x2f7   : > { %v1070_v9 = vmul.f32 0.03125, %v1068_v8 }
 0x2f9   : > { %v1071_v10 = vsub.f32 %v1065_v6, %v1070_v9 }
 0x2fb   : > { %v1072_v11 = vmul.f32 %v1071_v10, %v1071_v10 }
 0x2fd   : > { %v1073_v12 = vsel %vm631_vm0, %v1072_v11, 0.0 }
 0x2fe   : > { %1074 = vadd.xlane.f32.xlu0 %v1073_v12 }
 0x2ff   : > { %1687 = shalt.err (!%p1684_p4)
}
 0x300   : > { %s1688_s28 = scalar_lea.hbm %s2204_s12, 128  ;;  %s1692_s22 = scalar_lea.hbm %s2345_s25, 256 }
 0x301   : > { %p1689_p8 = scmp.ne.s32.totalorder %s2204_s12, %s1688_s28  ;;  %p1693_p13 = scmp.lt.u32.totalorder %s2204_s12, %s2345_s25 }
 0x302   : > { %p1694_p11 = scmp.lt.u32.totalorder %s1692_s22, %s1688_s28  ;;  %p1696_p12 = scmp.lt.u32.totalorder %s1688_s28, %s2204_s12 }
 0x303   : > { %p1690_p9 = pnand %p1689_p8, %p2346_p0 }
 0x304   : > { %p1695_p3 = por %p1694_p11, %p1693_p13 }
 0x305   : > { %p1691_p6 = pneg %p1690_p9 }
 0x306   : > { %p1697_p5 = por %p1696_p12, %p1695_p3 }
 0x308   : > { %p1698_p10 = pnand %p1697_p5, %p1691_p6 }
 0x30a   : > { %1701 = shalt.err (!%p1698_p10)
}
 0x30b   : > { %1503 = dma.vmem_to_hbm [thread:$0]  (%p2346_p0), %s1131_s11, 128, %s2204_s12, %s1104_s13  }
 0x30c   : > { %s2347_s21 = sld [smem:[#allocation26_spill]]  ;;  %s2348_s20 = sld [smem:[#allocation27_spill]] }
 0x30d   : > { %s600_s27 = scalar_lea.vmem [#allocation9], %s2062_s14  ;;  %s2349_s13 = sld [smem:[#allocation28_spill]] }
 0x30e   : > { %s1117_s22 = sshll.u32 %s600_s27, 4  ;;  %s1099_s24 = scalar_lea.sflag [#allocation5], %s2059_s29  ;;  %s2238_s22 = int_to_ptr.vmem [resolvable:$true] %s1117_s22 }
 0x30f   : > { %s1702_s23 = scalar_lea.vmem %s2238_s22, 128  ;;  %s1805_s14 = smov [#allocation9]  }
 0x310   : > { %p1703_p1 = scmp.ne.s32.totalorder %s2238_s22, %s1702_s23  ;;  %s1706_s15 = sshll.u32 %s1805_s14, 4  ;;  %s1707_s15 = int_to_ptr.vmem [resolvable:$false] %s1706_s15 }
 0x311   : > { %s1708_s26 = scalar_lea.vmem %s1707_s15, 256  ;;  %p1709_p4 = scmp.lt.s32.totalorder %s2238_s22, %s1707_s15 }
 0x312   : > { %v1358_v17 = vld [vmem:[%s2347_s21] ss:$0 sm:$0xff]  ;;  %p1704_p2 = pnand %p1703_p1, %p2346_p0  ;;  %p1710_p8 = scmp.lt.s32.totalorder %s1708_s26, %s1702_s23 }
 0x313   : > { %v1359_v19 = vld [vmem:[%s2348_s20] ss:$0 sm:$0xff]  ;;  %s2236_s8 = scalar_lea.hbm %s2349_s13, %s1362_s17 }
 0x314   : > { %p1705_p7 = pneg %p1704_p2  ;;  %p1711_p9 = por %p1710_p8, %p1709_p4 }
 0x316   : > { %p1712_p6 = pnand %p1711_p9, %p1705_p7 }
 0x38b   : > { %v1075_v13 = vpop.xlane.xlu0 %1074 }
 0x38c   : > { %v1076_v14 = vmul.f32 0.03125, %v1075_v13 }
 0x38e   : > { %v1077_v15 = vadd.f32 1e-05, %v1076_v14 }
 0x390   : > { %1584 = vrsqrt.f32 %v1077_v15 }
 0x39a   : > { %v1585_v16 = vpop.eup %1584 }
 0x39b   : > { %v1079_v18 = vmul.f32 %v1585_v16, %v1071_v10 }
 0x39d   : > { %v1087_v20 = vmul.f32 %v1358_v17, %v1079_v18 }
 0x39f   : > { %v1095_v21 = vadd.f32 %v1359_v19, %v1087_v20 }
 0x3a1   : > { %1096 = vst.msk [vmem:[%s600_s27] sm:$0xff] %vm631_vm0, %v1095_v21 }
 0x3a2   : > { %1715 = shalt.err (!%p1712_p6)
}
 0x3a3   : > { %s1716_s29 = scalar_lea.hbm %s2236_s8, 128  ;;  %s1720_s19 = scalar_lea.hbm %s2349_s13, 256 }
 0x3a4   : > { %p1717_p13 = scmp.ne.s32.totalorder %s2236_s8, %s1716_s29  ;;  %p1721_p12 = scmp.lt.u32.totalorder %s2236_s8, %s2349_s13 }
 0x3a5   : > { %p1722_p5 = scmp.lt.u32.totalorder %s1720_s19, %s1716_s29  ;;  %p1724_p1 = scmp.lt.u32.totalorder %s1716_s29, %s2236_s8 }
 0x3a6   : > { %p1718_p11 = pnand %p1717_p13, %p2346_p0 }
 0x3a7   : > { %p1723_p10 = por %p1722_p5, %p1721_p12 }
 0x3a8   : > { %p1719_p3 = pneg %p1718_p11 }
 0x3a9   : > { %p1725_p2 = por %p1724_p1, %p1723_p10 }
 0x3ab   : > { %p1726_p7 = pnand %p1725_p2, %p1719_p3 }
 0x3ad   : > { %1729 = shalt.err (!%p1726_p7)
}
 0x3ae   : > { %1502 = dma.vmem_to_hbm [thread:$0]  (%p2346_p0), %s2238_s22, 128, %s2236_s8, %s1099_s24  }
 0x3af PF: > { %s2350_s27 = sld [smem:[#allocation17_spill]]  ;;  %s2351_s12 = sld [smem:[#allocation21_spill]] }
 0x3b0   : > { %p2353_p8 = scmp.ge.s32.totalorder %s1796_s18, 2 }
 0x3b5   : > { %s1142_s11 = sand.u32 1, %s2350_s27   ;;  %p2352_p4 = scmp.ne.s32.totalorder %s2351_s12, 0 }
 0x3b6   : > { %s1143_s23 = scalar_lea.sflag [#allocation5], %s1142_s11 }
 0x3b7   : > { %p1518_p9 = pnand %p2353_p8, %p2352_p4 }
 0x3b9   : > { %1767 = dma.done.wait (!%p1518_p9), %s1143_s23, 128  }
 0x3ba   : > { %1769 = vsyncadd (!%p1518_p9), %s1143_s23, 4294967168  ;;  %s1152_s14 = scalar_lea.sflag [#allocation11], %s1142_s11 }
 0x3bb   : > { %1771 = dma.done.wait (!%p1518_p9), %s1152_s14, 128  }
 0x3bc   : > { %1773 = vsyncadd (!%p1518_p9), %s1152_s14, 4294967168  ;;  %s37_s18 = sadd.s32 1, %s1796_s18   ;;  %s2354_s16 = sld [smem:[#allocation18_spill]] }
 0x3bd   : > { %p34_p6 = scmp.ge.s32.totalorder %s37_s18, 4   ;;  %s2355_s15 = sld [smem:[#allocation24_spill]] }
 0x3be   : > { %s2356_s22 = sld [smem:[#allocation20_spill]]  ;;  %s2357_s17 = sld [smem:[#allocation22_spill]] }
 0x3bf   : > { %s2358_s29 = smov %s1780_s30  ;;  %36 = sbr.rel (!%p34_p6) target bundleno = 16 (0x10), region = 171 }
 0x3c2   : > { %s2359_s30 = smov %s2354_s16 }
 0x3c4   : > { %s2360_s16 = smov %s2356_s22 }
 0x3c6   :  { %1157 = vsyncpa [#allocation4], 1 }
 0x3c7   :  { %1159 = vsyncpa [#allocation4 + $0x1], 1 }
 0x3c8   :  { %1160 = vsyncpa [#allocation7], 1 }
 0x3c9   :  { %1162 = vsyncpa [#allocation7 + $0x1], 1 }
 0x3ca   :  { %1163 = vsyncpa [#allocation5], 1 }
 0x3cb   :  { %1165 = vsyncpa [#allocation5 + $0x1], 1 }
 0x3cc   :  { %1166 = vsyncpa [#allocation11], 1 }
 0x3cd   :  { %1168 = vsyncpa [#allocation11 + $0x1], 1 }

</bundles_post_ra>
